<compile_context>
chip_gen: v7x
topology: tpu7x:2x2x1
jax: 0.10.0
libtpu: 0.0.40
codegen_flags: <defaults>
</compile_context>

<pallas_src>
import functools

import jax
import jax.numpy as jnp
from jax.experimental import pallas as pl
from jax.experimental.pallas import tpu as pltpu


def _round_up(x, m):
    return ((x + m - 1) // m) * m


# ---------------------------------------------------------------------------
# Pallas kernels
# ---------------------------------------------------------------------------
def _lstm_stack_kernel(x_ref, wih0_ref, wihr_ref, whh_ref, b_ref,
                       h0_ref, c0_ref, y_ref, hT_ref, cT_ref, gates_ref,
                       *, n_layers, seq_len, batch, hidden):
    """Fused multi-layer LSTM. Single invocation (no grid); time loop inside.

    x_ref     : (T*Bp, E)   embedded inputs, time-major rows [t*Bp : (t+1)*Bp]
    wih0_ref  : (E, 4H)     layer-0 input->gates weight (pre-transposed)
    wihr_ref  : (max(L-1,1), H, 4H) input->gates weights for layers 1..L-1
    whh_ref   : (L, H, 4H)  hidden->gates weights (pre-transposed)
    b_ref     : (L, 1, 4H)  combined bias (b_ih + b_hh)
    h0/c0     : (L, Bp, H)  initial state
    y_ref     : (T*Bp, H)   final-layer outputs for all timesteps
    hT/cT     : (L, Bp, H)  final state per layer
    gates_ref : VMEM (T*Bp, 4H) scratch holding the hoisted input projection
    """
    T, Bp, H = seq_len, batch, hidden

    # Layer-0 input projection for ALL timesteps at once (one big MXU matmul),
    # combined bias folded in here so the time loop never re-adds it.
    gates_ref[...] = (
        jnp.dot(x_ref[...], wih0_ref[...], preferred_element_type=jnp.float32)
        + b_ref[0])

    for layer in range(n_layers):
        w_hh = whh_ref[layer]                       # (H, 4H), loaded once/layer

        def step(t, carry, w_hh=w_hh):
            h, c = carry
            row = pl.multiple_of(t * Bp, Bp)        # sublane-aligned row start
            g = (gates_ref[pl.ds(row, Bp), :]
                 + jnp.dot(h, w_hh, preferred_element_type=jnp.float32))
            i_g = jax.nn.sigmoid(g[:, 0 * H:1 * H])
            f_g = jax.nn.sigmoid(g[:, 1 * H:2 * H])
            g_g = jnp.tanh(g[:, 2 * H:3 * H])
            o_g = jax.nn.sigmoid(g[:, 3 * H:4 * H])
            c_new = f_g * c + i_g * g_g
            h_new = o_g * jnp.tanh(c_new)
            y_ref[pl.ds(row, Bp), :] = h_new
            return h_new, c_new

        h_fin, c_fin = jax.lax.fori_loop(
            0, T, step, (h0_ref[layer], c0_ref[layer]), unroll=(T <= 16))

        # Final state written once per layer (not every timestep).
        hT_ref[layer] = h_fin
        cT_ref[layer] = c_fin

        # Hoisted input projection for the NEXT layer: one big matmul over all
        # timesteps of this layer's output (still resident in VMEM).
        if layer + 1 < n_layers:
            gates_ref[...] = (
                jnp.dot(y_ref[...], wihr_ref[layer],
                        preferred_element_type=jnp.float32)
                + b_ref[layer + 1])


def _dense_kernel(x_ref, w_ref, b_ref, o_ref):
    o_ref[...] = (jnp.dot(x_ref[...], w_ref[...],
                          preferred_element_type=jnp.float32) + b_ref[...])


# ---------------------------------------------------------------------------
# Wrappers
# ---------------------------------------------------------------------------
def lstm_stack_pallas(x2d, wih0, wih_rest, whh, bias, h0, c0,
                      *, n_layers, seq_len, batch, hidden):
    T, Bp, H = seq_len, batch, hidden
    kernel = functools.partial(_lstm_stack_kernel, n_layers=n_layers,
                               seq_len=T, batch=Bp, hidden=H)
    return pl.pallas_call(
        kernel,
        out_shape=(jax.ShapeDtypeStruct((T * Bp, H), jnp.float32),
                   jax.ShapeDtypeStruct((n_layers, Bp, H), jnp.float32),
                   jax.ShapeDtypeStruct((n_layers, Bp, H), jnp.float32)),
        scratch_shapes=[pltpu.VMEM((T * Bp, 4 * H), jnp.float32)],
    )(x2d, wih0, wih_rest, whh, bias, h0, c0)


def dense_pallas(x2d, w_t, b, *, bm=256, bn=256):
    """Tiled (M, K) @ (K, V) + b with 'parallel' grid axes (megacore)."""
    M, K = x2d.shape
    V = w_t.shape[1]
    bm = M if (M <= bm or M % bm) else bm
    bn = V if (V <= bn or V % bn) else bn
    return pl.pallas_call(
        _dense_kernel,
        out_shape=jax.ShapeDtypeStruct((M, V), jnp.float32),
        grid=(M // bm, V // bn),
        in_specs=[pl.BlockSpec((bm, K), lambda i, j: (i, 0)),
                  pl.BlockSpec((K, bn), lambda i, j: (0, j)),
                  pl.BlockSpec((1, bn), lambda i, j: (0, j))],
        out_specs=pl.BlockSpec((bm, bn), lambda i, j: (i, j)),
        compiler_params=pltpu.CompilerParams(
            dimension_semantics=("parallel", "parallel")),
    )(x2d, w_t, b.reshape(1, V))


# ---------------------------------------------------------------------------
# Model (parameters + forward)
# ---------------------------------------------------------------------------
def init_params(key, n_vocab, embedding_size, lstm_size, n_layers):
    ks = jax.random.split(key, 3 + 4 * n_layers)
    k = 1.0 / jnp.sqrt(jnp.float32(lstm_size))
    H = lstm_size

    w_ih0 = None
    w_ih_rest, w_hh, bias = [], [], []
    for l in range(n_layers):
        in_size = embedding_size if l == 0 else lstm_size
        kk = ks[3 + 4 * l: 3 + 4 * (l + 1)]
        w_ih = jax.random.uniform(kk[0], (in_size, 4 * H), jnp.float32, -k, k)
        if l == 0:
            w_ih0 = w_ih
        else:
            w_ih_rest.append(w_ih)
        w_hh.append(jax.random.uniform(kk[1], (H, 4 * H), jnp.float32, -k, k))
        b_ih = jax.random.uniform(kk[2], (4 * H,), jnp.float32, -k, k)
        b_hh = jax.random.uniform(kk[3], (4 * H,), jnp.float32, -k, k)
        bias.append((b_ih + b_hh).reshape(1, 4 * H))

    if not w_ih_rest:                     # n_layers == 1: dummy slot, never read
        w_ih_rest.append(jnp.zeros((H, 4 * H), jnp.float32))

    return {
        "embedding": jax.random.normal(ks[0], (n_vocab, embedding_size),
                                       jnp.float32),
        "w_dense_t": jax.random.uniform(ks[1], (H, n_vocab), jnp.float32, -k, k),
        "b_dense": jax.random.uniform(ks[2], (n_vocab,), jnp.float32, -k, k),
        "w_ih0_t": w_ih0,                       # (E, 4H)
        "w_ih_rest_t": jnp.stack(w_ih_rest),    # (max(L-1,1), H, 4H)
        "w_hh_t": jnp.stack(w_hh),              # (L, H, 4H)
        "bias": jnp.stack(bias),                # (L, 1, 4H)
    }


def zero_state(n_layers, batch_size, lstm_size):
    z = jnp.zeros((n_layers, batch_size, lstm_size), jnp.float32)
    return (z, z)


def lstm_model_forward(params, x_tokens, prev_state, n_layers):
    """x_tokens: (B, T) int32.  Returns (logits (B,T,V), (h_n, c_n))."""
    h0_all, c0_all = prev_state                           # (L, B, H) each
    B, T = x_tokens.shape
    H = h0_all.shape[-1]
    Bp = _round_up(B, 8)                                  # sublane-aligned batch
    pad = Bp - B

    tok = jnp.pad(x_tokens, ((0, pad), (0, 0)))           # (Bp, T), int32 only
    emb = jnp.take(params["embedding"], tok.T, axis=0)    # (T, Bp, E) time-major
    x2d = emb.reshape(T * Bp, emb.shape[-1])              # free reshape

    h0p = jnp.pad(h0_all, ((0, 0), (0, pad), (0, 0)))
    c0p = jnp.pad(c0_all, ((0, 0), (0, pad), (0, 0)))

    y2d, hT, cT = lstm_stack_pallas(
        x2d, params["w_ih0_t"], params["w_ih_rest_t"], params["w_hh_t"],
        params["bias"], h0p, c0p,
        n_layers=n_layers, seq_len=T, batch=Bp, hidden=H)

    logits2d = dense_pallas(y2d, params["w_dense_t"], params["b_dense"])
    V = logits2d.shape[-1]
    logits = logits2d.reshape(T, Bp, V)[:, :B].transpose(1, 0, 2)   # (B, T, V)
    return logits, (hT[:, :B], cT[:, :B])


# ---------------------------------------------------------------------------
# Pure-JAX reference (for correctness check)
# ---------------------------------------------------------------------------
def ref_forward(params, x_tokens, prev_state, n_layers):
    h_all, c_all = prev_state
    emb = jnp.take(params["embedding"], x_tokens, axis=0)     # (B, T, E)
    xt = jnp.transpose(emb, (1, 0, 2))                        # (T, B, E)
    hs, cs = [], []
    for l in range(n_layers):
        w_ih = params["w_ih0_t"] if l == 0 else params["w_ih_rest_t"][l - 1]
        w_hh = params["w_hh_t"][l]
        b = params["bias"][l]
        h, c = h_all[l], c_all[l]
        H = h.shape[-1]
        ys = []
        for t in range(xt.shape[0]):
            g = xt[t] @ w_ih + h @ w_hh + b
            i_g = jax.nn.sigmoid(g[:, :H])
            f_g = jax.nn.sigmoid(g[:, H:2 * H])
            g_g = jnp.tanh(g[:, 2 * H:3 * H])
            o_g = jax.nn.sigmoid(g[:, 3 * H:])
            c = f_g * c + i_g * g_g
            h = o_g * jnp.tanh(c)
            ys.append(h)
        xt = jnp.stack(ys)
        hs.append(h)
        cs.append(c)
    out = jnp.transpose(xt, (1, 0, 2))
    logits = out @ params["w_dense_t"] + params["b_dense"]
    return logits, (jnp.stack(hs), jnp.stack(cs))


# ---------------------------------------------------------------------------
if __name__ == "__main__":
    n_vocab = 64
    seq_size = 8
    embedding_size = 32
    lstm_size = 32
    n_layers = 2
    batch = 2

    key = jax.random.PRNGKey(0)
    k_param, k_tok = jax.random.split(key)

    params = init_params(k_param, n_vocab, embedding_size, lstm_size, n_layers)
    x_tokens = jax.random.randint(k_tok, (batch, seq_size), 0, n_vocab,
                                  dtype=jnp.int32)
    prev_state = zero_state(n_layers, batch, lstm_size)

    fwd = functools.partial(lstm_model_forward, n_layers=n_layers)
    logits, (h_n, c_n) = fwd(params, x_tokens, prev_state)
    jax.block_until_ready((logits, h_n, c_n))

    # Correctness check vs. pure-JAX reference.
    ref_logits, (ref_h, ref_c) = ref_forward(params, x_tokens, prev_state,
                                             n_layers)
    assert logits.shape == (batch, seq_size, n_vocab)
    assert h_n.shape == (n_layers, batch, lstm_size)
    assert c_n.shape == (n_layers, batch, lstm_size)
    assert jnp.allclose(logits, ref_logits, rtol=1e-3, atol=1e-3)
    assert jnp.allclose(h_n, ref_h, rtol=1e-3, atol=1e-3)
    assert jnp.allclose(c_n, ref_c, rtol=1e-3, atol=1e-3)

    print("KERNEL_OK")
</pallas_src>

<mosaic_0001>
module attributes {stable_mosaic.version = 11 : i64} {
  func.func @_lstm_stack_kernel(%arg0: memref<64x32xf32, #tpu.memory_space<vmem>>, %arg1: memref<32x128xf32, #tpu.memory_space<vmem>>, %arg2: memref<1x32x128xf32, #tpu.memory_space<vmem>>, %arg3: memref<2x32x128xf32, #tpu.memory_space<vmem>>, %arg4: memref<2x1x128xf32, #tpu.memory_space<vmem>>, %arg5: memref<2x8x32xf32, #tpu.memory_space<vmem>>, %arg6: memref<2x8x32xf32, #tpu.memory_space<vmem>>, %arg7: memref<64x32xf32, #tpu.memory_space<vmem>>, %arg8: memref<2x8x32xf32, #tpu.memory_space<vmem>>, %arg9: memref<2x8x32xf32, #tpu.memory_space<vmem>>, %arg10: memref<64x128xf32, #tpu.memory_space<vmem>>) attributes {dimension_semantics = [], scalar_prefetch = 0 : i64, scratch_operands = 1 : i64, tpu.core_type = #tpu.core_type<tc>} {
    %c0 = arith.constant 0 : index
    %c0_0 = arith.constant 0 : index
    %0 = vector.load %arg0[%c0, %c0_0] : memref<64x32xf32, #tpu.memory_space<vmem>>, vector<64x32xf32>
    %c0_1 = arith.constant 0 : index
    %c0_2 = arith.constant 0 : index
    %1 = vector.load %arg1[%c0_1, %c0_2] : memref<32x128xf32, #tpu.memory_space<vmem>>, vector<32x128xf32>
    %cst = arith.constant dense<0.000000e+00> : vector<64x128xf32>
    %2 = tpu.matmul %0, %1, %cst {dimension_numbers = #tpu.dot_dimension_numbers<[1], [0], [0], [1], [0, 0, 1, 1], [], []>} : vector<64x32xf32>, vector<32x128xf32>, vector<64x128xf32> -> vector<64x128xf32>
    %c0_3 = arith.constant 0 : index
    %c0_4 = arith.constant 0 : index
    %c0_5 = arith.constant 0 : index
    %3 = vector.load %arg4[%c0_3, %c0_4, %c0_5] : memref<2x1x128xf32, #tpu.memory_space<vmem>>, vector<1x1x128xf32>
    %4 = vector.shape_cast %3 : vector<1x1x128xf32> to vector<1x128xf32>
    %5 = vector.broadcast %4 : vector<1x128xf32> to vector<64x128xf32>
    %6 = arith.addf %2, %5 : vector<64x128xf32>
    %c0_6 = arith.constant 0 : index
    %c0_7 = arith.constant 0 : index
    %7 = vector.load %arg10[%c0_6, %c0_7] : memref<64x128xf32, #tpu.memory_space<vmem>>, vector<64x128xf32>
    tpu.vector_store %arg10[%c0_6, %c0_7], %6 {strides = array<i32>} : memref<64x128xf32, #tpu.memory_space<vmem>>, vector<64x128xf32>,
    %c0_8 = arith.constant 0 : index
    %c0_9 = arith.constant 0 : index
    %c0_10 = arith.constant 0 : index
    %8 = vector.load %arg3[%c0_8, %c0_9, %c0_10] : memref<2x32x128xf32, #tpu.memory_space<vmem>>, vector<1x32x128xf32>
    %9 = vector.shape_cast %8 : vector<1x32x128xf32> to vector<32x128xf32>
    %c0_11 = arith.constant 0 : index
    %c0_12 = arith.constant 0 : index
    %c0_13 = arith.constant 0 : index
    %10 = vector.load %arg5[%c0_11, %c0_12, %c0_13] : memref<2x8x32xf32, #tpu.memory_space<vmem>>, vector<1x8x32xf32>
    %11 = vector.shape_cast %10 : vector<1x8x32xf32> to vector<8x32xf32>
    %c0_14 = arith.constant 0 : index
    %c0_15 = arith.constant 0 : index
    %c0_16 = arith.constant 0 : index
    %12 = vector.load %arg6[%c0_14, %c0_15, %c0_16] : memref<2x8x32xf32, #tpu.memory_space<vmem>>, vector<1x8x32xf32>
    %13 = vector.shape_cast %12 : vector<1x8x32xf32> to vector<8x32xf32>
    %c0_i32 = arith.constant 0 : i32
    %c8_i32 = arith.constant 8 : i32
    %14 = arith.muli %c0_i32, %c8_i32 : i32
    %15 = tpu.assume_multiple %14, 8 : i32
    %16 = arith.index_cast %15 : i32 to index
    %c0_17 = arith.constant 0 : index
    %17 = vector.load %arg10[%16, %c0_17] : memref<64x128xf32, #tpu.memory_space<vmem>>, vector<8x128xf32>
    %cst_18 = arith.constant dense<0.000000e+00> : vector<8x128xf32>
    %18 = tpu.matmul %11, %9, %cst_18 {dimension_numbers = #tpu.dot_dimension_numbers<[1], [0], [0], [1], [0, 0, 1, 1], [], []>} : vector<8x32xf32>, vector<32x128xf32>, vector<8x128xf32> -> vector<8x128xf32>
    %19 = arith.addf %17, %18 : vector<8x128xf32>
    %20 = vector.extract_strided_slice %19 {offsets = [0, 0], sizes = [8, 32], strides = [1, 1]} : vector<8x128xf32> to vector<8x32xf32>
    %21 = arith.negf %20 : vector<8x32xf32>
    %22 = math.exp %21 : vector<8x32xf32>
    %cst_19 = arith.constant 1.000000e+00 : f32
    %23 = vector.broadcast %cst_19 : f32 to vector<8x32xf32>
    %24 = arith.addf %23, %22 : vector<8x32xf32>
    %25 = arith.divf %23, %24 : vector<8x32xf32>
    %26 = vector.extract_strided_slice %19 {offsets = [0, 32], sizes = [8, 32], strides = [1, 1]} : vector<8x128xf32> to vector<8x32xf32>
    %27 = arith.negf %26 : vector<8x32xf32>
    %28 = math.exp %27 : vector<8x32xf32>
    %cst_20 = arith.constant 1.000000e+00 : f32
    %29 = vector.broadcast %cst_20 : f32 to vector<8x32xf32>
    %30 = arith.addf %29, %28 : vector<8x32xf32>
    %31 = arith.divf %29, %30 : vector<8x32xf32>
    %32 = vector.extract_strided_slice %19 {offsets = [0, 64], sizes = [8, 32], strides = [1, 1]} : vector<8x128xf32> to vector<8x32xf32>
    %33 = math.tanh %32 : vector<8x32xf32>
    %34 = vector.extract_strided_slice %19 {offsets = [0, 96], sizes = [8, 32], strides = [1, 1]} : vector<8x128xf32> to vector<8x32xf32>
    %35 = arith.negf %34 : vector<8x32xf32>
    %36 = math.exp %35 : vector<8x32xf32>
    %cst_21 = arith.constant 1.000000e+00 : f32
    %37 = vector.broadcast %cst_21 : f32 to vector<8x32xf32>
    %38 = arith.addf %37, %36 : vector<8x32xf32>
    %39 = arith.divf %37, %38 : vector<8x32xf32>
    %40 = arith.mulf %31, %13 : vector<8x32xf32>
    %41 = arith.mulf %25, %33 : vector<8x32xf32>
    %42 = arith.addf %40, %41 : vector<8x32xf32>
    %43 = math.tanh %42 : vector<8x32xf32>
    %44 = arith.mulf %39, %43 : vector<8x32xf32>
    %45 = arith.index_cast %15 : i32 to index
    %c0_22 = arith.constant 0 : index
    %46 = vector.load %arg7[%45, %c0_22] : memref<64x32xf32, #tpu.memory_space<vmem>>, vector<8x32xf32>
    tpu.vector_store %arg7[%45, %c0_22], %44 {strides = array<i32>} : memref<64x32xf32, #tpu.memory_space<vmem>>, vector<8x32xf32>,
    %c1_i32 = arith.constant 1 : i32
    %c8_i32_23 = arith.constant 8 : i32
    %47 = arith.muli %c1_i32, %c8_i32_23 : i32
    %48 = tpu.assume_multiple %47, 8 : i32
    %49 = arith.index_cast %48 : i32 to index
    %c0_24 = arith.constant 0 : index
    %50 = vector.load %arg10[%49, %c0_24] : memref<64x128xf32, #tpu.memory_space<vmem>>, vector<8x128xf32>
    %cst_25 = arith.constant dense<0.000000e+00> : vector<8x128xf32>
    %51 = tpu.matmul %44, %9, %cst_25 {dimension_numbers = #tpu.dot_dimension_numbers<[1], [0], [0], [1], [0, 0, 1, 1], [], []>} : vector<8x32xf32>, vector<32x128xf32>, vector<8x128xf32> -> vector<8x128xf32>
    %52 = arith.addf %50, %51 : vector<8x128xf32>
    %53 = vector.extract_strided_slice %52 {offsets = [0, 0], sizes = [8, 32], strides = [1, 1]} : vector<8x128xf32> to vector<8x32xf32>
    %54 = arith.negf %53 : vector<8x32xf32>
    %55 = math.exp %54 : vector<8x32xf32>
    %cst_26 = arith.constant 1.000000e+00 : f32
    %56 = vector.broadcast %cst_26 : f32 to vector<8x32xf32>
    %57 = arith.addf %56, %55 : vector<8x32xf32>
    %58 = arith.divf %56, %57 : vector<8x32xf32>
    %59 = vector.extract_strided_slice %52 {offsets = [0, 32], sizes = [8, 32], strides = [1, 1]} : vector<8x128xf32> to vector<8x32xf32>
    %60 = arith.negf %59 : vector<8x32xf32>
    %61 = math.exp %60 : vector<8x32xf32>
    %cst_27 = arith.constant 1.000000e+00 : f32
    %62 = vector.broadcast %cst_27 : f32 to vector<8x32xf32>
    %63 = arith.addf %62, %61 : vector<8x32xf32>
    %64 = arith.divf %62, %63 : vector<8x32xf32>
    %65 = vector.extract_strided_slice %52 {offsets = [0, 64], sizes = [8, 32], strides = [1, 1]} : vector<8x128xf32> to vector<8x32xf32>
    %66 = math.tanh %65 : vector<8x32xf32>
    %67 = vector.extract_strided_slice %52 {offsets = [0, 96], sizes = [8, 32], strides = [1, 1]} : vector<8x128xf32> to vector<8x32xf32>
    %68 = arith.negf %67 : vector<8x32xf32>
    %69 = math.exp %68 : vector<8x32xf32>
    %cst_28 = arith.constant 1.000000e+00 : f32
    %70 = vector.broadcast %cst_28 : f32 to vector<8x32xf32>
    %71 = arith.addf %70, %69 : vector<8x32xf32>
    %72 = arith.divf %70, %71 : vector<8x32xf32>
    %73 = arith.mulf %64, %42 : vector<8x32xf32>
    %74 = arith.mulf %58, %66 : vector<8x32xf32>
    %75 = arith.addf %73, %74 : vector<8x32xf32>
    %76 = math.tanh %75 : vector<8x32xf32>
    %77 = arith.mulf %72, %76 : vector<8x32xf32>
    %78 = arith.index_cast %48 : i32 to index
    %c0_29 = arith.constant 0 : index
    %79 = vector.load %arg7[%78, %c0_29] : memref<64x32xf32, #tpu.memory_space<vmem>>, vector<8x32xf32>
    tpu.vector_store %arg7[%78, %c0_29], %77 {strides = array<i32>} : memref<64x32xf32, #tpu.memory_space<vmem>>, vector<8x32xf32>,
    %c2_i32 = arith.constant 2 : i32
    %c8_i32_30 = arith.constant 8 : i32
    %80 = arith.muli %c2_i32, %c8_i32_30 : i32
    %81 = tpu.assume_multiple %80, 8 : i32
    %82 = arith.index_cast %81 : i32 to index
    %c0_31 = arith.constant 0 : index
    %83 = vector.load %arg10[%82, %c0_31] : memref<64x128xf32, #tpu.memory_space<vmem>>, vector<8x128xf32>
    %cst_32 = arith.constant dense<0.000000e+00> : vector<8x128xf32>
    %84 = tpu.matmul %77, %9, %cst_32 {dimension_numbers = #tpu.dot_dimension_numbers<[1], [0], [0], [1], [0, 0, 1, 1], [], []>} : vector<8x32xf32>, vector<32x128xf32>, vector<8x128xf32> -> vector<8x128xf32>
    %85 = arith.addf %83, %84 : vector<8x128xf32>
    %86 = vector.extract_strided_slice %85 {offsets = [0, 0], sizes = [8, 32], strides = [1, 1]} : vector<8x128xf32> to vector<8x32xf32>
    %87 = arith.negf %86 : vector<8x32xf32>
    %88 = math.exp %87 : vector<8x32xf32>
    %cst_33 = arith.constant 1.000000e+00 : f32
    %89 = vector.broadcast %cst_33 : f32 to vector<8x32xf32>
    %90 = arith.addf %89, %88 : vector<8x32xf32>
    %91 = arith.divf %89, %90 : vector<8x32xf32>
    %92 = vector.extract_strided_slice %85 {offsets = [0, 32], sizes = [8, 32], strides = [1, 1]} : vector<8x128xf32> to vector<8x32xf32>
    %93 = arith.negf %92 : vector<8x32xf32>
    %94 = math.exp %93 : vector<8x32xf32>
    %cst_34 = arith.constant 1.000000e+00 : f32
    %95 = vector.broadcast %cst_34 : f32 to vector<8x32xf32>
    %96 = arith.addf %95, %94 : vector<8x32xf32>
    %97 = arith.divf %95, %96 : vector<8x32xf32>
    %98 = vector.extract_strided_slice %85 {offsets = [0, 64], sizes = [8, 32], strides = [1, 1]} : vector<8x128xf32> to vector<8x32xf32>
    %99 = math.tanh %98 : vector<8x32xf32>
    %100 = vector.extract_strided_slice %85 {offsets = [0, 96], sizes = [8, 32], strides = [1, 1]} : vector<8x128xf32> to vector<8x32xf32>
    %101 = arith.negf %100 : vector<8x32xf32>
    %102 = math.exp %101 : vector<8x32xf32>
    %cst_35 = arith.constant 1.000000e+00 : f32
    %103 = vector.broadcast %cst_35 : f32 to vector<8x32xf32>
    %104 = arith.addf %103, %102 : vector<8x32xf32>
    %105 = arith.divf %103, %104 : vector<8x32xf32>
    %106 = arith.mulf %97, %75 : vector<8x32xf32>
    %107 = arith.mulf %91, %99 : vector<8x32xf32>
    %108 = arith.addf %106, %107 : vector<8x32xf32>
    %109 = math.tanh %108 : vector<8x32xf32>
    %110 = arith.mulf %105, %109 : vector<8x32xf32>
    %111 = arith.index_cast %81 : i32 to index
    %c0_36 = arith.constant 0 : index
    %112 = vector.load %arg7[%111, %c0_36] : memref<64x32xf32, #tpu.memory_space<vmem>>, vector<8x32xf32>
    tpu.vector_store %arg7[%111, %c0_36], %110 {strides = array<i32>} : memref<64x32xf32, #tpu.memory_space<vmem>>, vector<8x32xf32>,
    %c3_i32 = arith.constant 3 : i32
    %c8_i32_37 = arith.constant 8 : i32
    %113 = arith.muli %c3_i32, %c8_i32_37 : i32
    %114 = tpu.assume_multiple %113, 8 : i32
    %115 = arith.index_cast %114 : i32 to index
    %c0_38 = arith.constant 0 : index
    %116 = vector.load %arg10[%115, %c0_38] : memref<64x128xf32, #tpu.memory_space<vmem>>, vector<8x128xf32>
    %cst_39 = arith.constant dense<0.000000e+00> : vector<8x128xf32>
    %117 = tpu.matmul %110, %9, %cst_39 {dimension_numbers = #tpu.dot_dimension_numbers<[1], [0], [0], [1], [0, 0, 1, 1], [], []>} : vector<8x32xf32>, vector<32x128xf32>, vector<8x128xf32> -> vector<8x128xf32>
    %118 = arith.addf %116, %117 : vector<8x128xf32>
    %119 = vector.extract_strided_slice %118 {offsets = [0, 0], sizes = [8, 32], strides = [1, 1]} : vector<8x128xf32> to vector<8x32xf32>
    %120 = arith.negf %119 : vector<8x32xf32>
    %121 = math.exp %120 : vector<8x32xf32>
    %cst_40 = arith.constant 1.000000e+00 : f32
    %122 = vector.broadcast %cst_40 : f32 to vector<8x32xf32>
    %123 = arith.addf %122, %121 : vector<8x32xf32>
    %124 = arith.divf %122, %123 : vector<8x32xf32>
    %125 = vector.extract_strided_slice %118 {offsets = [0, 32], sizes = [8, 32], strides = [1, 1]} : vector<8x128xf32> to vector<8x32xf32>
    %126 = arith.negf %125 : vector<8x32xf32>
    %127 = math.exp %126 : vector<8x32xf32>
    %cst_41 = arith.constant 1.000000e+00 : f32
    %128 = vector.broadcast %cst_41 : f32 to vector<8x32xf32>
    %129 = arith.addf %128, %127 : vector<8x32xf32>
    %130 = arith.divf %128, %129 : vector<8x32xf32>
    %131 = vector.extract_strided_slice %118 {offsets = [0, 64], sizes = [8, 32], strides = [1, 1]} : vector<8x128xf32> to vector<8x32xf32>
    %132 = math.tanh %131 : vector<8x32xf32>
    %133 = vector.extract_strided_slice %118 {offsets = [0, 96], sizes = [8, 32], strides = [1, 1]} : vector<8x128xf32> to vector<8x32xf32>
    %134 = arith.negf %133 : vector<8x32xf32>
    %135 = math.exp %134 : vector<8x32xf32>
    %cst_42 = arith.constant 1.000000e+00 : f32
    %136 = vector.broadcast %cst_42 : f32 to vector<8x32xf32>
    %137 = arith.addf %136, %135 : vector<8x32xf32>
    %138 = arith.divf %136, %137 : vector<8x32xf32>
    %139 = arith.mulf %130, %108 : vector<8x32xf32>
    %140 = arith.mulf %124, %132 : vector<8x32xf32>
    %141 = arith.addf %139, %140 : vector<8x32xf32>
    %142 = math.tanh %141 : vector<8x32xf32>
    %143 = arith.mulf %138, %142 : vector<8x32xf32>
    %144 = arith.index_cast %114 : i32 to index
    %c0_43 = arith.constant 0 : index
    %145 = vector.load %arg7[%144, %c0_43] : memref<64x32xf32, #tpu.memory_space<vmem>>, vector<8x32xf32>
    tpu.vector_store %arg7[%144, %c0_43], %143 {strides = array<i32>} : memref<64x32xf32, #tpu.memory_space<vmem>>, vector<8x32xf32>,
    %c4_i32 = arith.constant 4 : i32
    %c8_i32_44 = arith.constant 8 : i32
    %146 = arith.muli %c4_i32, %c8_i32_44 : i32
    %147 = tpu.assume_multiple %146, 8 : i32
    %148 = arith.index_cast %147 : i32 to index
    %c0_45 = arith.constant 0 : index
    %149 = vector.load %arg10[%148, %c0_45] : memref<64x128xf32, #tpu.memory_space<vmem>>, vector<8x128xf32>
    %cst_46 = arith.constant dense<0.000000e+00> : vector<8x128xf32>
    %150 = tpu.matmul %143, %9, %cst_46 {dimension_numbers = #tpu.dot_dimension_numbers<[1], [0], [0], [1], [0, 0, 1, 1], [], []>} : vector<8x32xf32>, vector<32x128xf32>, vector<8x128xf32> -> vector<8x128xf32>
    %151 = arith.addf %149, %150 : vector<8x128xf32>
    %152 = vector.extract_strided_slice %151 {offsets = [0, 0], sizes = [8, 32], strides = [1, 1]} : vector<8x128xf32> to vector<8x32xf32>
    %153 = arith.negf %152 : vector<8x32xf32>
    %154 = math.exp %153 : vector<8x32xf32>
    %cst_47 = arith.constant 1.000000e+00 : f32
    %155 = vector.broadcast %cst_47 : f32 to vector<8x32xf32>
    %156 = arith.addf %155, %154 : vector<8x32xf32>
    %157 = arith.divf %155, %156 : vector<8x32xf32>
    %158 = vector.extract_strided_slice %151 {offsets = [0, 32], sizes = [8, 32], strides = [1, 1]} : vector<8x128xf32> to vector<8x32xf32>
    %159 = arith.negf %158 : vector<8x32xf32>
    %160 = math.exp %159 : vector<8x32xf32>
    %cst_48 = arith.constant 1.000000e+00 : f32
    %161 = vector.broadcast %cst_48 : f32 to vector<8x32xf32>
    %162 = arith.addf %161, %160 : vector<8x32xf32>
    %163 = arith.divf %161, %162 : vector<8x32xf32>
    %164 = vector.extract_strided_slice %151 {offsets = [0, 64], sizes = [8, 32], strides = [1, 1]} : vector<8x128xf32> to vector<8x32xf32>
    %165 = math.tanh %164 : vector<8x32xf32>
    %166 = vector.extract_strided_slice %151 {offsets = [0, 96], sizes = [8, 32], strides = [1, 1]} : vector<8x128xf32> to vector<8x32xf32>
    %167 = arith.negf %166 : vector<8x32xf32>
    %168 = math.exp %167 : vector<8x32xf32>
    %cst_49 = arith.constant 1.000000e+00 : f32
    %169 = vector.broadcast %cst_49 : f32 to vector<8x32xf32>
    %170 = arith.addf %169, %168 : vector<8x32xf32>
    %171 = arith.divf %169, %170 : vector<8x32xf32>
    %172 = arith.mulf %163, %141 : vector<8x32xf32>
    %173 = arith.mulf %157, %165 : vector<8x32xf32>
    %174 = arith.addf %172, %173 : vector<8x32xf32>
    %175 = math.tanh %174 : vector<8x32xf32>
    %176 = arith.mulf %171, %175 : vector<8x32xf32>
    %177 = arith.index_cast %147 : i32 to index
    %c0_50 = arith.constant 0 : index
    %178 = vector.load %arg7[%177, %c0_50] : memref<64x32xf32, #tpu.memory_space<vmem>>, vector<8x32xf32>
    tpu.vector_store %arg7[%177, %c0_50], %176 {strides = array<i32>} : memref<64x32xf32, #tpu.memory_space<vmem>>, vector<8x32xf32>,
    %c5_i32 = arith.constant 5 : i32
    %c8_i32_51 = arith.constant 8 : i32
    %179 = arith.muli %c5_i32, %c8_i32_51 : i32
    %180 = tpu.assume_multiple %179, 8 : i32
    %181 = arith.index_cast %180 : i32 to index
    %c0_52 = arith.constant 0 : index
    %182 = vector.load %arg10[%181, %c0_52] : memref<64x128xf32, #tpu.memory_space<vmem>>, vector<8x128xf32>
    %cst_53 = arith.constant dense<0.000000e+00> : vector<8x128xf32>
    %183 = tpu.matmul %176, %9, %cst_53 {dimension_numbers = #tpu.dot_dimension_numbers<[1], [0], [0], [1], [0, 0, 1, 1], [], []>} : vector<8x32xf32>, vector<32x128xf32>, vector<8x128xf32> -> vector<8x128xf32>
    %184 = arith.addf %182, %183 : vector<8x128xf32>
    %185 = vector.extract_strided_slice %184 {offsets = [0, 0], sizes = [8, 32], strides = [1, 1]} : vector<8x128xf32> to vector<8x32xf32>
    %186 = arith.negf %185 : vector<8x32xf32>
    %187 = math.exp %186 : vector<8x32xf32>
    %cst_54 = arith.constant 1.000000e+00 : f32
    %188 = vector.broadcast %cst_54 : f32 to vector<8x32xf32>
    %189 = arith.addf %188, %187 : vector<8x32xf32>
    %190 = arith.divf %188, %189 : vector<8x32xf32>
    %191 = vector.extract_strided_slice %184 {offsets = [0, 32], sizes = [8, 32], strides = [1, 1]} : vector<8x128xf32> to vector<8x32xf32>
    %192 = arith.negf %191 : vector<8x32xf32>
    %193 = math.exp %192 : vector<8x32xf32>
    %cst_55 = arith.constant 1.000000e+00 : f32
    %194 = vector.broadcast %cst_55 : f32 to vector<8x32xf32>
    %195 = arith.addf %194, %193 : vector<8x32xf32>
    %196 = arith.divf %194, %195 : vector<8x32xf32>
    %197 = vector.extract_strided_slice %184 {offsets = [0, 64], sizes = [8, 32], strides = [1, 1]} : vector<8x128xf32> to vector<8x32xf32>
    %198 = math.tanh %197 : vector<8x32xf32>
    %199 = vector.extract_strided_slice %184 {offsets = [0, 96], sizes = [8, 32], strides = [1, 1]} : vector<8x128xf32> to vector<8x32xf32>
    %200 = arith.negf %199 : vector<8x32xf32>
    %201 = math.exp %200 : vector<8x32xf32>
    %cst_56 = arith.constant 1.000000e+00 : f32
    %202 = vector.broadcast %cst_56 : f32 to vector<8x32xf32>
    %203 = arith.addf %202, %201 : vector<8x32xf32>
    %204 = arith.divf %202, %203 : vector<8x32xf32>
    %205 = arith.mulf %196, %174 : vector<8x32xf32>
    %206 = arith.mulf %190, %198 : vector<8x32xf32>
    %207 = arith.addf %205, %206 : vector<8x32xf32>
    %208 = math.tanh %207 : vector<8x32xf32>
    %209 = arith.mulf %204, %208 : vector<8x32xf32>
    %210 = arith.index_cast %180 : i32 to index
    %c0_57 = arith.constant 0 : index
    %211 = vector.load %arg7[%210, %c0_57] : memref<64x32xf32, #tpu.memory_space<vmem>>, vector<8x32xf32>
    tpu.vector_store %arg7[%210, %c0_57], %209 {strides = array<i32>} : memref<64x32xf32, #tpu.memory_space<vmem>>, vector<8x32xf32>,
    %c6_i32 = arith.constant 6 : i32
    %c8_i32_58 = arith.constant 8 : i32
    %212 = arith.muli %c6_i32, %c8_i32_58 : i32
    %213 = tpu.assume_multiple %212, 8 : i32
    %214 = arith.index_cast %213 : i32 to index
    %c0_59 = arith.constant 0 : index
    %215 = vector.load %arg10[%214, %c0_59] : memref<64x128xf32, #tpu.memory_space<vmem>>, vector<8x128xf32>
    %cst_60 = arith.constant dense<0.000000e+00> : vector<8x128xf32>
    %216 = tpu.matmul %209, %9, %cst_60 {dimension_numbers = #tpu.dot_dimension_numbers<[1], [0], [0], [1], [0, 0, 1, 1], [], []>} : vector<8x32xf32>, vector<32x128xf32>, vector<8x128xf32> -> vector<8x128xf32>
    %217 = arith.addf %215, %216 : vector<8x128xf32>
    %218 = vector.extract_strided_slice %217 {offsets = [0, 0], sizes = [8, 32], strides = [1, 1]} : vector<8x128xf32> to vector<8x32xf32>
    %219 = arith.negf %218 : vector<8x32xf32>
    %220 = math.exp %219 : vector<8x32xf32>
    %cst_61 = arith.constant 1.000000e+00 : f32
    %221 = vector.broadcast %cst_61 : f32 to vector<8x32xf32>
    %222 = arith.addf %221, %220 : vector<8x32xf32>
    %223 = arith.divf %221, %222 : vector<8x32xf32>
    %224 = vector.extract_strided_slice %217 {offsets = [0, 32], sizes = [8, 32], strides = [1, 1]} : vector<8x128xf32> to vector<8x32xf32>
    %225 = arith.negf %224 : vector<8x32xf32>
    %226 = math.exp %225 : vector<8x32xf32>
    %cst_62 = arith.constant 1.000000e+00 : f32
    %227 = vector.broadcast %cst_62 : f32 to vector<8x32xf32>
    %228 = arith.addf %227, %226 : vector<8x32xf32>
    %229 = arith.divf %227, %228 : vector<8x32xf32>
    %230 = vector.extract_strided_slice %217 {offsets = [0, 64], sizes = [8, 32], strides = [1, 1]} : vector<8x128xf32> to vector<8x32xf32>
    %231 = math.tanh %230 : vector<8x32xf32>
    %232 = vector.extract_strided_slice %217 {offsets = [0, 96], sizes = [8, 32], strides = [1, 1]} : vector<8x128xf32> to vector<8x32xf32>
    %233 = arith.negf %232 : vector<8x32xf32>
    %234 = math.exp %233 : vector<8x32xf32>
    %cst_63 = arith.constant 1.000000e+00 : f32
    %235 = vector.broadcast %cst_63 : f32 to vector<8x32xf32>
    %236 = arith.addf %235, %234 : vector<8x32xf32>
    %237 = arith.divf %235, %236 : vector<8x32xf32>
    %238 = arith.mulf %229, %207 : vector<8x32xf32>
    %239 = arith.mulf %223, %231 : vector<8x32xf32>
    %240 = arith.addf %238, %239 : vector<8x32xf32>
    %241 = math.tanh %240 : vector<8x32xf32>
    %242 = arith.mulf %237, %241 : vector<8x32xf32>
    %243 = arith.index_cast %213 : i32 to index
    %c0_64 = arith.constant 0 : index
    %244 = vector.load %arg7[%243, %c0_64] : memref<64x32xf32, #tpu.memory_space<vmem>>, vector<8x32xf32>
    tpu.vector_store %arg7[%243, %c0_64], %242 {strides = array<i32>} : memref<64x32xf32, #tpu.memory_space<vmem>>, vector<8x32xf32>,
    %c7_i32 = arith.constant 7 : i32
    %c8_i32_65 = arith.constant 8 : i32
    %245 = arith.muli %c7_i32, %c8_i32_65 : i32
    %246 = tpu.assume_multiple %245, 8 : i32
    %247 = arith.index_cast %246 : i32 to index
    %c0_66 = arith.constant 0 : index
    %248 = vector.load %arg10[%247, %c0_66] : memref<64x128xf32, #tpu.memory_space<vmem>>, vector<8x128xf32>
    %cst_67 = arith.constant dense<0.000000e+00> : vector<8x128xf32>
    %249 = tpu.matmul %242, %9, %cst_67 {dimension_numbers = #tpu.dot_dimension_numbers<[1], [0], [0], [1], [0, 0, 1, 1], [], []>} : vector<8x32xf32>, vector<32x128xf32>, vector<8x128xf32> -> vector<8x128xf32>
    %250 = arith.addf %248, %249 : vector<8x128xf32>
    %251 = vector.extract_strided_slice %250 {offsets = [0, 0], sizes = [8, 32], strides = [1, 1]} : vector<8x128xf32> to vector<8x32xf32>
    %252 = arith.negf %251 : vector<8x32xf32>
    %253 = math.exp %252 : vector<8x32xf32>
    %cst_68 = arith.constant 1.000000e+00 : f32
    %254 = vector.broadcast %cst_68 : f32 to vector<8x32xf32>
    %255 = arith.addf %254, %253 : vector<8x32xf32>
    %256 = arith.divf %254, %255 : vector<8x32xf32>
    %257 = vector.extract_strided_slice %250 {offsets = [0, 32], sizes = [8, 32], strides = [1, 1]} : vector<8x128xf32> to vector<8x32xf32>
    %258 = arith.negf %257 : vector<8x32xf32>
    %259 = math.exp %258 : vector<8x32xf32>
    %cst_69 = arith.constant 1.000000e+00 : f32
    %260 = vector.broadcast %cst_69 : f32 to vector<8x32xf32>
    %261 = arith.addf %260, %259 : vector<8x32xf32>
    %262 = arith.divf %260, %261 : vector<8x32xf32>
    %263 = vector.extract_strided_slice %250 {offsets = [0, 64], sizes = [8, 32], strides = [1, 1]} : vector<8x128xf32> to vector<8x32xf32>
    %264 = math.tanh %263 : vector<8x32xf32>
    %265 = vector.extract_strided_slice %250 {offsets = [0, 96], sizes = [8, 32], strides = [1, 1]} : vector<8x128xf32> to vector<8x32xf32>
    %266 = arith.negf %265 : vector<8x32xf32>
    %267 = math.exp %266 : vector<8x32xf32>
    %cst_70 = arith.constant 1.000000e+00 : f32
    %268 = vector.broadcast %cst_70 : f32 to vector<8x32xf32>
    %269 = arith.addf %268, %267 : vector<8x32xf32>
    %270 = arith.divf %268, %269 : vector<8x32xf32>
    %271 = arith.mulf %262, %240 : vector<8x32xf32>
    %272 = arith.mulf %256, %264 : vector<8x32xf32>
    %273 = arith.addf %271, %272 : vector<8x32xf32>
    %274 = math.tanh %273 : vector<8x32xf32>
    %275 = arith.mulf %270, %274 : vector<8x32xf32>
    %276 = arith.index_cast %246 : i32 to index
    %c0_71 = arith.constant 0 : index
    %277 = vector.load %arg7[%276, %c0_71] : memref<64x32xf32, #tpu.memory_space<vmem>>, vector<8x32xf32>
    tpu.vector_store %arg7[%276, %c0_71], %275 {strides = array<i32>} : memref<64x32xf32, #tpu.memory_space<vmem>>, vector<8x32xf32>,
    %c8_i32_72 = arith.constant 8 : i32
    %c0_73 = arith.constant 0 : index
    %c0_74 = arith.constant 0 : index
    %c0_75 = arith.constant 0 : index
    %278 = vector.load %arg8[%c0_73, %c0_74, %c0_75] : memref<2x8x32xf32, #tpu.memory_space<vmem>>, vector<1x8x32xf32>
    %279 = vector.shape_cast %278 : vector<1x8x32xf32> to vector<8x32xf32>
    %280 = vector.shape_cast %275 : vector<8x32xf32> to vector<1x8x32xf32>
    tpu.vector_store %arg8[%c0_73, %c0_74, %c0_75], %280 {strides = array<i32>} : memref<2x8x32xf32, #tpu.memory_space<vmem>>, vector<1x8x32xf32>,
    %c0_76 = arith.constant 0 : index
    %c0_77 = arith.constant 0 : index
    %c0_78 = arith.constant 0 : index
    %281 = vector.load %arg9[%c0_76, %c0_77, %c0_78] : memref<2x8x32xf32, #tpu.memory_space<vmem>>, vector<1x8x32xf32>
    %282 = vector.shape_cast %281 : vector<1x8x32xf32> to vector<8x32xf32>
    %283 = vector.shape_cast %273 : vector<8x32xf32> to vector<1x8x32xf32>
    tpu.vector_store %arg9[%c0_76, %c0_77, %c0_78], %283 {strides = array<i32>} : memref<2x8x32xf32, #tpu.memory_space<vmem>>, vector<1x8x32xf32>,
    %c0_79 = arith.constant 0 : index
    %c0_80 = arith.constant 0 : index
    %284 = vector.load %arg7[%c0_79, %c0_80] : memref<64x32xf32, #tpu.memory_space<vmem>>, vector<64x32xf32>
    %c0_81 = arith.constant 0 : index
    %c0_82 = arith.constant 0 : index
    %c0_83 = arith.constant 0 : index
    %285 = vector.load %arg2[%c0_81, %c0_82, %c0_83] : memref<1x32x128xf32, #tpu.memory_space<vmem>>, vector<1x32x128xf32>
    %286 = vector.shape_cast %285 : vector<1x32x128xf32> to vector<32x128xf32>
    %cst_84 = arith.constant dense<0.000000e+00> : vector<64x128xf32>
    %287 = tpu.matmul %284, %286, %cst_84 {dimension_numbers = #tpu.dot_dimension_numbers<[1], [0], [0], [1], [0, 0, 1, 1], [], []>} : vector<64x32xf32>, vector<32x128xf32>, vector<64x128xf32> -> vector<64x128xf32>
    %c1 = arith.constant 1 : index
    %c0_85 = arith.constant 0 : index
    %c0_86 = arith.constant 0 : index
    %288 = vector.load %arg4[%c1, %c0_85, %c0_86] : memref<2x1x128xf32, #tpu.memory_space<vmem>>, vector<1x1x128xf32>
    %289 = vector.shape_cast %288 : vector<1x1x128xf32> to vector<1x128xf32>
    %290 = vector.broadcast %289 : vector<1x128xf32> to vector<64x128xf32>
    %291 = arith.addf %287, %290 : vector<64x128xf32>
    %c0_87 = arith.constant 0 : index
    %c0_88 = arith.constant 0 : index
    %292 = vector.load %arg10[%c0_87, %c0_88] : memref<64x128xf32, #tpu.memory_space<vmem>>, vector<64x128xf32>
    tpu.vector_store %arg10[%c0_87, %c0_88], %291 {strides = array<i32>} : memref<64x128xf32, #tpu.memory_space<vmem>>, vector<64x128xf32>,
    %c1_89 = arith.constant 1 : index
    %c0_90 = arith.constant 0 : index
    %c0_91 = arith.constant 0 : index
    %293 = vector.load %arg3[%c1_89, %c0_90, %c0_91] : memref<2x32x128xf32, #tpu.memory_space<vmem>>, vector<1x32x128xf32>
    %294 = vector.shape_cast %293 : vector<1x32x128xf32> to vector<32x128xf32>
    %c1_92 = arith.constant 1 : index
    %c0_93 = arith.constant 0 : index
    %c0_94 = arith.constant 0 : index
    %295 = vector.load %arg5[%c1_92, %c0_93, %c0_94] : memref<2x8x32xf32, #tpu.memory_space<vmem>>, vector<1x8x32xf32>
    %296 = vector.shape_cast %295 : vector<1x8x32xf32> to vector<8x32xf32>
    %c1_95 = arith.constant 1 : index
    %c0_96 = arith.constant 0 : index
    %c0_97 = arith.constant 0 : index
    %297 = vector.load %arg6[%c1_95, %c0_96, %c0_97] : memref<2x8x32xf32, #tpu.memory_space<vmem>>, vector<1x8x32xf32>
    %298 = vector.shape_cast %297 : vector<1x8x32xf32> to vector<8x32xf32>
    %c0_i32_98 = arith.constant 0 : i32
    %c8_i32_99 = arith.constant 8 : i32
    %299 = arith.muli %c0_i32_98, %c8_i32_99 : i32
    %300 = tpu.assume_multiple %299, 8 : i32
    %301 = arith.index_cast %300 : i32 to index
    %c0_100 = arith.constant 0 : index
    %302 = vector.load %arg10[%301, %c0_100] : memref<64x128xf32, #tpu.memory_space<vmem>>, vector<8x128xf32>
    %cst_101 = arith.constant dense<0.000000e+00> : vector<8x128xf32>
    %303 = tpu.matmul %296, %294, %cst_101 {dimension_numbers = #tpu.dot_dimension_numbers<[1], [0], [0], [1], [0, 0, 1, 1], [], []>} : vector<8x32xf32>, vector<32x128xf32>, vector<8x128xf32> -> vector<8x128xf32>
    %304 = arith.addf %302, %303 : vector<8x128xf32>
    %305 = vector.extract_strided_slice %304 {offsets = [0, 0], sizes = [8, 32], strides = [1, 1]} : vector<8x128xf32> to vector<8x32xf32>
    %306 = arith.negf %305 : vector<8x32xf32>
    %307 = math.exp %306 : vector<8x32xf32>
    %cst_102 = arith.constant 1.000000e+00 : f32
    %308 = vector.broadcast %cst_102 : f32 to vector<8x32xf32>
    %309 = arith.addf %308, %307 : vector<8x32xf32>
    %310 = arith.divf %308, %309 : vector<8x32xf32>
    %311 = vector.extract_strided_slice %304 {offsets = [0, 32], sizes = [8, 32], strides = [1, 1]} : vector<8x128xf32> to vector<8x32xf32>
    %312 = arith.negf %311 : vector<8x32xf32>
    %313 = math.exp %312 : vector<8x32xf32>
    %cst_103 = arith.constant 1.000000e+00 : f32
    %314 = vector.broadcast %cst_103 : f32 to vector<8x32xf32>
    %315 = arith.addf %314, %313 : vector<8x32xf32>
    %316 = arith.divf %314, %315 : vector<8x32xf32>
    %317 = vector.extract_strided_slice %304 {offsets = [0, 64], sizes = [8, 32], strides = [1, 1]} : vector<8x128xf32> to vector<8x32xf32>
    %318 = math.tanh %317 : vector<8x32xf32>
    %319 = vector.extract_strided_slice %304 {offsets = [0, 96], sizes = [8, 32], strides = [1, 1]} : vector<8x128xf32> to vector<8x32xf32>
    %320 = arith.negf %319 : vector<8x32xf32>
    %321 = math.exp %320 : vector<8x32xf32>
    %cst_104 = arith.constant 1.000000e+00 : f32
    %322 = vector.broadcast %cst_104 : f32 to vector<8x32xf32>
    %323 = arith.addf %322, %321 : vector<8x32xf32>
    %324 = arith.divf %322, %323 : vector<8x32xf32>
    %325 = arith.mulf %316, %298 : vector<8x32xf32>
    %326 = arith.mulf %310, %318 : vector<8x32xf32>
    %327 = arith.addf %325, %326 : vector<8x32xf32>
    %328 = math.tanh %327 : vector<8x32xf32>
    %329 = arith.mulf %324, %328 : vector<8x32xf32>
    %330 = arith.index_cast %300 : i32 to index
    %c0_105 = arith.constant 0 : index
    %331 = vector.load %arg7[%330, %c0_105] : memref<64x32xf32, #tpu.memory_space<vmem>>, vector<8x32xf32>
    tpu.vector_store %arg7[%330, %c0_105], %329 {strides = array<i32>} : memref<64x32xf32, #tpu.memory_space<vmem>>, vector<8x32xf32>,
    %c1_i32_106 = arith.constant 1 : i32
    %c8_i32_107 = arith.constant 8 : i32
    %332 = arith.muli %c1_i32_106, %c8_i32_107 : i32
    %333 = tpu.assume_multiple %332, 8 : i32
    %334 = arith.index_cast %333 : i32 to index
    %c0_108 = arith.constant 0 : index
    %335 = vector.load %arg10[%334, %c0_108] : memref<64x128xf32, #tpu.memory_space<vmem>>, vector<8x128xf32>
    %cst_109 = arith.constant dense<0.000000e+00> : vector<8x128xf32>
    %336 = tpu.matmul %329, %294, %cst_109 {dimension_numbers = #tpu.dot_dimension_numbers<[1], [0], [0], [1], [0, 0, 1, 1], [], []>} : vector<8x32xf32>, vector<32x128xf32>, vector<8x128xf32> -> vector<8x128xf32>
    %337 = arith.addf %335, %336 : vector<8x128xf32>
    %338 = vector.extract_strided_slice %337 {offsets = [0, 0], sizes = [8, 32], strides = [1, 1]} : vector<8x128xf32> to vector<8x32xf32>
    %339 = arith.negf %338 : vector<8x32xf32>
    %340 = math.exp %339 : vector<8x32xf32>
    %cst_110 = arith.constant 1.000000e+00 : f32
    %341 = vector.broadcast %cst_110 : f32 to vector<8x32xf32>
    %342 = arith.addf %341, %340 : vector<8x32xf32>
    %343 = arith.divf %341, %342 : vector<8x32xf32>
    %344 = vector.extract_strided_slice %337 {offsets = [0, 32], sizes = [8, 32], strides = [1, 1]} : vector<8x128xf32> to vector<8x32xf32>
    %345 = arith.negf %344 : vector<8x32xf32>
    %346 = math.exp %345 : vector<8x32xf32>
    %cst_111 = arith.constant 1.000000e+00 : f32
    %347 = vector.broadcast %cst_111 : f32 to vector<8x32xf32>
    %348 = arith.addf %347, %346 : vector<8x32xf32>
    %349 = arith.divf %347, %348 : vector<8x32xf32>
    %350 = vector.extract_strided_slice %337 {offsets = [0, 64], sizes = [8, 32], strides = [1, 1]} : vector<8x128xf32> to vector<8x32xf32>
    %351 = math.tanh %350 : vector<8x32xf32>
    %352 = vector.extract_strided_slice %337 {offsets = [0, 96], sizes = [8, 32], strides = [1, 1]} : vector<8x128xf32> to vector<8x32xf32>
    %353 = arith.negf %352 : vector<8x32xf32>
    %354 = math.exp %353 : vector<8x32xf32>
    %cst_112 = arith.constant 1.000000e+00 : f32
    %355 = vector.broadcast %cst_112 : f32 to vector<8x32xf32>
    %356 = arith.addf %355, %354 : vector<8x32xf32>
    %357 = arith.divf %355, %356 : vector<8x32xf32>
    %358 = arith.mulf %349, %327 : vector<8x32xf32>
    %359 = arith.mulf %343, %351 : vector<8x32xf32>
    %360 = arith.addf %358, %359 : vector<8x32xf32>
    %361 = math.tanh %360 : vector<8x32xf32>
    %362 = arith.mulf %357, %361 : vector<8x32xf32>
    %363 = arith.index_cast %333 : i32 to index
    %c0_113 = arith.constant 0 : index
    %364 = vector.load %arg7[%363, %c0_113] : memref<64x32xf32, #tpu.memory_space<vmem>>, vector<8x32xf32>
    tpu.vector_store %arg7[%363, %c0_113], %362 {strides = array<i32>} : memref<64x32xf32, #tpu.memory_space<vmem>>, vector<8x32xf32>,
    %c2_i32_114 = arith.constant 2 : i32
    %c8_i32_115 = arith.constant 8 : i32
    %365 = arith.muli %c2_i32_114, %c8_i32_115 : i32
    %366 = tpu.assume_multiple %365, 8 : i32
    %367 = arith.index_cast %366 : i32 to index
    %c0_116 = arith.constant 0 : index
    %368 = vector.load %arg10[%367, %c0_116] : memref<64x128xf32, #tpu.memory_space<vmem>>, vector<8x128xf32>
    %cst_117 = arith.constant dense<0.000000e+00> : vector<8x128xf32>
    %369 = tpu.matmul %362, %294, %cst_117 {dimension_numbers = #tpu.dot_dimension_numbers<[1], [0], [0], [1], [0, 0, 1, 1], [], []>} : vector<8x32xf32>, vector<32x128xf32>, vector<8x128xf32> -> vector<8x128xf32>
    %370 = arith.addf %368, %369 : vector<8x128xf32>
    %371 = vector.extract_strided_slice %370 {offsets = [0, 0], sizes = [8, 32], strides = [1, 1]} : vector<8x128xf32> to vector<8x32xf32>
    %372 = arith.negf %371 : vector<8x32xf32>
    %373 = math.exp %372 : vector<8x32xf32>
    %cst_118 = arith.constant 1.000000e+00 : f32
    %374 = vector.broadcast %cst_118 : f32 to vector<8x32xf32>
    %375 = arith.addf %374, %373 : vector<8x32xf32>
    %376 = arith.divf %374, %375 : vector<8x32xf32>
    %377 = vector.extract_strided_slice %370 {offsets = [0, 32], sizes = [8, 32], strides = [1, 1]} : vector<8x128xf32> to vector<8x32xf32>
    %378 = arith.negf %377 : vector<8x32xf32>
    %379 = math.exp %378 : vector<8x32xf32>
    %cst_119 = arith.constant 1.000000e+00 : f32
    %380 = vector.broadcast %cst_119 : f32 to vector<8x32xf32>
    %381 = arith.addf %380, %379 : vector<8x32xf32>
    %382 = arith.divf %380, %381 : vector<8x32xf32>
    %383 = vector.extract_strided_slice %370 {offsets = [0, 64], sizes = [8, 32], strides = [1, 1]} : vector<8x128xf32> to vector<8x32xf32>
    %384 = math.tanh %383 : vector<8x32xf32>
    %385 = vector.extract_strided_slice %370 {offsets = [0, 96], sizes = [8, 32], strides = [1, 1]} : vector<8x128xf32> to vector<8x32xf32>
    %386 = arith.negf %385 : vector<8x32xf32>
    %387 = math.exp %386 : vector<8x32xf32>
    %cst_120 = arith.constant 1.000000e+00 : f32
    %388 = vector.broadcast %cst_120 : f32 to vector<8x32xf32>
    %389 = arith.addf %388, %387 : vector<8x32xf32>
    %390 = arith.divf %388, %389 : vector<8x32xf32>
    %391 = arith.mulf %382, %360 : vector<8x32xf32>
    %392 = arith.mulf %376, %384 : vector<8x32xf32>
    %393 = arith.addf %391, %392 : vector<8x32xf32>
    %394 = math.tanh %393 : vector<8x32xf32>
    %395 = arith.mulf %390, %394 : vector<8x32xf32>
    %396 = arith.index_cast %366 : i32 to index
    %c0_121 = arith.constant 0 : index
    %397 = vector.load %arg7[%396, %c0_121] : memref<64x32xf32, #tpu.memory_space<vmem>>, vector<8x32xf32>
    tpu.vector_store %arg7[%396, %c0_121], %395 {strides = array<i32>} : memref<64x32xf32, #tpu.memory_space<vmem>>, vector<8x32xf32>,
    %c3_i32_122 = arith.constant 3 : i32
    %c8_i32_123 = arith.constant 8 : i32
    %398 = arith.muli %c3_i32_122, %c8_i32_123 : i32
    %399 = tpu.assume_multiple %398, 8 : i32
    %400 = arith.index_cast %399 : i32 to index
    %c0_124 = arith.constant 0 : index
    %401 = vector.load %arg10[%400, %c0_124] : memref<64x128xf32, #tpu.memory_space<vmem>>, vector<8x128xf32>
    %cst_125 = arith.constant dense<0.000000e+00> : vector<8x128xf32>
    %402 = tpu.matmul %395, %294, %cst_125 {dimension_numbers = #tpu.dot_dimension_numbers<[1], [0], [0], [1], [0, 0, 1, 1], [], []>} : vector<8x32xf32>, vector<32x128xf32>, vector<8x128xf32> -> vector<8x128xf32>
    %403 = arith.addf %401, %402 : vector<8x128xf32>
    %404 = vector.extract_strided_slice %403 {offsets = [0, 0], sizes = [8, 32], strides = [1, 1]} : vector<8x128xf32> to vector<8x32xf32>
    %405 = arith.negf %404 : vector<8x32xf32>
    %406 = math.exp %405 : vector<8x32xf32>
    %cst_126 = arith.constant 1.000000e+00 : f32
    %407 = vector.broadcast %cst_126 : f32 to vector<8x32xf32>
    %408 = arith.addf %407, %406 : vector<8x32xf32>
    %409 = arith.divf %407, %408 : vector<8x32xf32>
    %410 = vector.extract_strided_slice %403 {offsets = [0, 32], sizes = [8, 32], strides = [1, 1]} : vector<8x128xf32> to vector<8x32xf32>
    %411 = arith.negf %410 : vector<8x32xf32>
    %412 = math.exp %411 : vector<8x32xf32>
    %cst_127 = arith.constant 1.000000e+00 : f32
    %413 = vector.broadcast %cst_127 : f32 to vector<8x32xf32>
    %414 = arith.addf %413, %412 : vector<8x32xf32>
    %415 = arith.divf %413, %414 : vector<8x32xf32>
    %416 = vector.extract_strided_slice %403 {offsets = [0, 64], sizes = [8, 32], strides = [1, 1]} : vector<8x128xf32> to vector<8x32xf32>
    %417 = math.tanh %416 : vector<8x32xf32>
    %418 = vector.extract_strided_slice %403 {offsets = [0, 96], sizes = [8, 32], strides = [1, 1]} : vector<8x128xf32> to vector<8x32xf32>
    %419 = arith.negf %418 : vector<8x32xf32>
    %420 = math.exp %419 : vector<8x32xf32>
    %cst_128 = arith.constant 1.000000e+00 : f32
    %421 = vector.broadcast %cst_128 : f32 to vector<8x32xf32>
    %422 = arith.addf %421, %420 : vector<8x32xf32>
    %423 = arith.divf %421, %422 : vector<8x32xf32>
    %424 = arith.mulf %415, %393 : vector<8x32xf32>
    %425 = arith.mulf %409, %417 : vector<8x32xf32>
    %426 = arith.addf %424, %425 : vector<8x32xf32>
    %427 = math.tanh %426 : vector<8x32xf32>
    %428 = arith.mulf %423, %427 : vector<8x32xf32>
    %429 = arith.index_cast %399 : i32 to index
    %c0_129 = arith.constant 0 : index
    %430 = vector.load %arg7[%429, %c0_129] : memref<64x32xf32, #tpu.memory_space<vmem>>, vector<8x32xf32>
    tpu.vector_store %arg7[%429, %c0_129], %428 {strides = array<i32>} : memref<64x32xf32, #tpu.memory_space<vmem>>, vector<8x32xf32>,
    %c4_i32_130 = arith.constant 4 : i32
    %c8_i32_131 = arith.constant 8 : i32
    %431 = arith.muli %c4_i32_130, %c8_i32_131 : i32
    %432 = tpu.assume_multiple %431, 8 : i32
    %433 = arith.index_cast %432 : i32 to index
    %c0_132 = arith.constant 0 : index
    %434 = vector.load %arg10[%433, %c0_132] : memref<64x128xf32, #tpu.memory_space<vmem>>, vector<8x128xf32>
    %cst_133 = arith.constant dense<0.000000e+00> : vector<8x128xf32>
    %435 = tpu.matmul %428, %294, %cst_133 {dimension_numbers = #tpu.dot_dimension_numbers<[1], [0], [0], [1], [0, 0, 1, 1], [], []>} : vector<8x32xf32>, vector<32x128xf32>, vector<8x128xf32> -> vector<8x128xf32>
    %436 = arith.addf %434, %435 : vector<8x128xf32>
    %437 = vector.extract_strided_slice %436 {offsets = [0, 0], sizes = [8, 32], strides = [1, 1]} : vector<8x128xf32> to vector<8x32xf32>
    %438 = arith.negf %437 : vector<8x32xf32>
    %439 = math.exp %438 : vector<8x32xf32>
    %cst_134 = arith.constant 1.000000e+00 : f32
    %440 = vector.broadcast %cst_134 : f32 to vector<8x32xf32>
    %441 = arith.addf %440, %439 : vector<8x32xf32>
    %442 = arith.divf %440, %441 : vector<8x32xf32>
    %443 = vector.extract_strided_slice %436 {offsets = [0, 32], sizes = [8, 32], strides = [1, 1]} : vector<8x128xf32> to vector<8x32xf32>
    %444 = arith.negf %443 : vector<8x32xf32>
    %445 = math.exp %444 : vector<8x32xf32>
    %cst_135 = arith.constant 1.000000e+00 : f32
    %446 = vector.broadcast %cst_135 : f32 to vector<8x32xf32>
    %447 = arith.addf %446, %445 : vector<8x32xf32>
    %448 = arith.divf %446, %447 : vector<8x32xf32>
    %449 = vector.extract_strided_slice %436 {offsets = [0, 64], sizes = [8, 32], strides = [1, 1]} : vector<8x128xf32> to vector<8x32xf32>
    %450 = math.tanh %449 : vector<8x32xf32>
    %451 = vector.extract_strided_slice %436 {offsets = [0, 96], sizes = [8, 32], strides = [1, 1]} : vector<8x128xf32> to vector<8x32xf32>
    %452 = arith.negf %451 : vector<8x32xf32>
    %453 = math.exp %452 : vector<8x32xf32>
    %cst_136 = arith.constant 1.000000e+00 : f32
    %454 = vector.broadcast %cst_136 : f32 to vector<8x32xf32>
    %455 = arith.addf %454, %453 : vector<8x32xf32>
    %456 = arith.divf %454, %455 : vector<8x32xf32>
    %457 = arith.mulf %448, %426 : vector<8x32xf32>
    %458 = arith.mulf %442, %450 : vector<8x32xf32>
    %459 = arith.addf %457, %458 : vector<8x32xf32>
    %460 = math.tanh %459 : vector<8x32xf32>
    %461 = arith.mulf %456, %460 : vector<8x32xf32>
    %462 = arith.index_cast %432 : i32 to index
    %c0_137 = arith.constant 0 : index
    %463 = vector.load %arg7[%462, %c0_137] : memref<64x32xf32, #tpu.memory_space<vmem>>, vector<8x32xf32>
    tpu.vector_store %arg7[%462, %c0_137], %461 {strides = array<i32>} : memref<64x32xf32, #tpu.memory_space<vmem>>, vector<8x32xf32>,
    %c5_i32_138 = arith.constant 5 : i32
    %c8_i32_139 = arith.constant 8 : i32
    %464 = arith.muli %c5_i32_138, %c8_i32_139 : i32
    %465 = tpu.assume_multiple %464, 8 : i32
    %466 = arith.index_cast %465 : i32 to index
    %c0_140 = arith.constant 0 : index
    %467 = vector.load %arg10[%466, %c0_140] : memref<64x128xf32, #tpu.memory_space<vmem>>, vector<8x128xf32>
    %cst_141 = arith.constant dense<0.000000e+00> : vector<8x128xf32>
    %468 = tpu.matmul %461, %294, %cst_141 {dimension_numbers = #tpu.dot_dimension_numbers<[1], [0], [0], [1], [0, 0, 1, 1], [], []>} : vector<8x32xf32>, vector<32x128xf32>, vector<8x128xf32> -> vector<8x128xf32>
    %469 = arith.addf %467, %468 : vector<8x128xf32>
    %470 = vector.extract_strided_slice %469 {offsets = [0, 0], sizes = [8, 32], strides = [1, 1]} : vector<8x128xf32> to vector<8x32xf32>
    %471 = arith.negf %470 : vector<8x32xf32>
    %472 = math.exp %471 : vector<8x32xf32>
    %cst_142 = arith.constant 1.000000e+00 : f32
    %473 = vector.broadcast %cst_142 : f32 to vector<8x32xf32>
    %474 = arith.addf %473, %472 : vector<8x32xf32>
    %475 = arith.divf %473, %474 : vector<8x32xf32>
    %476 = vector.extract_strided_slice %469 {offsets = [0, 32], sizes = [8, 32], strides = [1, 1]} : vector<8x128xf32> to vector<8x32xf32>
    %477 = arith.negf %476 : vector<8x32xf32>
    %478 = math.exp %477 : vector<8x32xf32>
    %cst_143 = arith.constant 1.000000e+00 : f32
    %479 = vector.broadcast %cst_143 : f32 to vector<8x32xf32>
    %480 = arith.addf %479, %478 : vector<8x32xf32>
    %481 = arith.divf %479, %480 : vector<8x32xf32>
    %482 = vector.extract_strided_slice %469 {offsets = [0, 64], sizes = [8, 32], strides = [1, 1]} : vector<8x128xf32> to vector<8x32xf32>
    %483 = math.tanh %482 : vector<8x32xf32>
    %484 = vector.extract_strided_slice %469 {offsets = [0, 96], sizes = [8, 32], strides = [1, 1]} : vector<8x128xf32> to vector<8x32xf32>
    %485 = arith.negf %484 : vector<8x32xf32>
    %486 = math.exp %485 : vector<8x32xf32>
    %cst_144 = arith.constant 1.000000e+00 : f32
    %487 = vector.broadcast %cst_144 : f32 to vector<8x32xf32>
    %488 = arith.addf %487, %486 : vector<8x32xf32>
    %489 = arith.divf %487, %488 : vector<8x32xf32>
    %490 = arith.mulf %481, %459 : vector<8x32xf32>
    %491 = arith.mulf %475, %483 : vector<8x32xf32>
    %492 = arith.addf %490, %491 : vector<8x32xf32>
    %493 = math.tanh %492 : vector<8x32xf32>
    %494 = arith.mulf %489, %493 : vector<8x32xf32>
    %495 = arith.index_cast %465 : i32 to index
    %c0_145 = arith.constant 0 : index
    %496 = vector.load %arg7[%495, %c0_145] : memref<64x32xf32, #tpu.memory_space<vmem>>, vector<8x32xf32>
    tpu.vector_store %arg7[%495, %c0_145], %494 {strides = array<i32>} : memref<64x32xf32, #tpu.memory_space<vmem>>, vector<8x32xf32>,
    %c6_i32_146 = arith.constant 6 : i32
    %c8_i32_147 = arith.constant 8 : i32
    %497 = arith.muli %c6_i32_146, %c8_i32_147 : i32
    %498 = tpu.assume_multiple %497, 8 : i32
    %499 = arith.index_cast %498 : i32 to index
    %c0_148 = arith.constant 0 : index
    %500 = vector.load %arg10[%499, %c0_148] : memref<64x128xf32, #tpu.memory_space<vmem>>, vector<8x128xf32>
    %cst_149 = arith.constant dense<0.000000e+00> : vector<8x128xf32>
    %501 = tpu.matmul %494, %294, %cst_149 {dimension_numbers = #tpu.dot_dimension_numbers<[1], [0], [0], [1], [0, 0, 1, 1], [], []>} : vector<8x32xf32>, vector<32x128xf32>, vector<8x128xf32> -> vector<8x128xf32>
    %502 = arith.addf %500, %501 : vector<8x128xf32>
    %503 = vector.extract_strided_slice %502 {offsets = [0, 0], sizes = [8, 32], strides = [1, 1]} : vector<8x128xf32> to vector<8x32xf32>
    %504 = arith.negf %503 : vector<8x32xf32>
    %505 = math.exp %504 : vector<8x32xf32>
    %cst_150 = arith.constant 1.000000e+00 : f32
    %506 = vector.broadcast %cst_150 : f32 to vector<8x32xf32>
    %507 = arith.addf %506, %505 : vector<8x32xf32>
    %508 = arith.divf %506, %507 : vector<8x32xf32>
    %509 = vector.extract_strided_slice %502 {offsets = [0, 32], sizes = [8, 32], strides = [1, 1]} : vector<8x128xf32> to vector<8x32xf32>
    %510 = arith.negf %509 : vector<8x32xf32>
    %511 = math.exp %510 : vector<8x32xf32>
    %cst_151 = arith.constant 1.000000e+00 : f32
    %512 = vector.broadcast %cst_151 : f32 to vector<8x32xf32>
    %513 = arith.addf %512, %511 : vector<8x32xf32>
    %514 = arith.divf %512, %513 : vector<8x32xf32>
    %515 = vector.extract_strided_slice %502 {offsets = [0, 64], sizes = [8, 32], strides = [1, 1]} : vector<8x128xf32> to vector<8x32xf32>
    %516 = math.tanh %515 : vector<8x32xf32>
    %517 = vector.extract_strided_slice %502 {offsets = [0, 96], sizes = [8, 32], strides = [1, 1]} : vector<8x128xf32> to vector<8x32xf32>
    %518 = arith.negf %517 : vector<8x32xf32>
    %519 = math.exp %518 : vector<8x32xf32>
    %cst_152 = arith.constant 1.000000e+00 : f32
    %520 = vector.broadcast %cst_152 : f32 to vector<8x32xf32>
    %521 = arith.addf %520, %519 : vector<8x32xf32>
    %522 = arith.divf %520, %521 : vector<8x32xf32>
    %523 = arith.mulf %514, %492 : vector<8x32xf32>
    %524 = arith.mulf %508, %516 : vector<8x32xf32>
    %525 = arith.addf %523, %524 : vector<8x32xf32>
    %526 = math.tanh %525 : vector<8x32xf32>
    %527 = arith.mulf %522, %526 : vector<8x32xf32>
    %528 = arith.index_cast %498 : i32 to index
    %c0_153 = arith.constant 0 : index
    %529 = vector.load %arg7[%528, %c0_153] : memref<64x32xf32, #tpu.memory_space<vmem>>, vector<8x32xf32>
    tpu.vector_store %arg7[%528, %c0_153], %527 {strides = array<i32>} : memref<64x32xf32, #tpu.memory_space<vmem>>, vector<8x32xf32>,
    %c7_i32_154 = arith.constant 7 : i32
    %c8_i32_155 = arith.constant 8 : i32
    %530 = arith.muli %c7_i32_154, %c8_i32_155 : i32
    %531 = tpu.assume_multiple %530, 8 : i32
    %532 = arith.index_cast %531 : i32 to index
    %c0_156 = arith.constant 0 : index
    %533 = vector.load %arg10[%532, %c0_156] : memref<64x128xf32, #tpu.memory_space<vmem>>, vector<8x128xf32>
    %cst_157 = arith.constant dense<0.000000e+00> : vector<8x128xf32>
    %534 = tpu.matmul %527, %294, %cst_157 {dimension_numbers = #tpu.dot_dimension_numbers<[1], [0], [0], [1], [0, 0, 1, 1], [], []>} : vector<8x32xf32>, vector<32x128xf32>, vector<8x128xf32> -> vector<8x128xf32>
    %535 = arith.addf %533, %534 : vector<8x128xf32>
    %536 = vector.extract_strided_slice %535 {offsets = [0, 0], sizes = [8, 32], strides = [1, 1]} : vector<8x128xf32> to vector<8x32xf32>
    %537 = arith.negf %536 : vector<8x32xf32>
    %538 = math.exp %537 : vector<8x32xf32>
    %cst_158 = arith.constant 1.000000e+00 : f32
    %539 = vector.broadcast %cst_158 : f32 to vector<8x32xf32>
    %540 = arith.addf %539, %538 : vector<8x32xf32>
    %541 = arith.divf %539, %540 : vector<8x32xf32>
    %542 = vector.extract_strided_slice %535 {offsets = [0, 32], sizes = [8, 32], strides = [1, 1]} : vector<8x128xf32> to vector<8x32xf32>
    %543 = arith.negf %542 : vector<8x32xf32>
    %544 = math.exp %543 : vector<8x32xf32>
    %cst_159 = arith.constant 1.000000e+00 : f32
    %545 = vector.broadcast %cst_159 : f32 to vector<8x32xf32>
    %546 = arith.addf %545, %544 : vector<8x32xf32>
    %547 = arith.divf %545, %546 : vector<8x32xf32>
    %548 = vector.extract_strided_slice %535 {offsets = [0, 64], sizes = [8, 32], strides = [1, 1]} : vector<8x128xf32> to vector<8x32xf32>
    %549 = math.tanh %548 : vector<8x32xf32>
    %550 = vector.extract_strided_slice %535 {offsets = [0, 96], sizes = [8, 32], strides = [1, 1]} : vector<8x128xf32> to vector<8x32xf32>
    %551 = arith.negf %550 : vector<8x32xf32>
    %552 = math.exp %551 : vector<8x32xf32>
    %cst_160 = arith.constant 1.000000e+00 : f32
    %553 = vector.broadcast %cst_160 : f32 to vector<8x32xf32>
    %554 = arith.addf %553, %552 : vector<8x32xf32>
    %555 = arith.divf %553, %554 : vector<8x32xf32>
    %556 = arith.mulf %547, %525 : vector<8x32xf32>
    %557 = arith.mulf %541, %549 : vector<8x32xf32>
    %558 = arith.addf %556, %557 : vector<8x32xf32>
    %559 = math.tanh %558 : vector<8x32xf32>
    %560 = arith.mulf %555, %559 : vector<8x32xf32>
    %561 = arith.index_cast %531 : i32 to index
    %c0_161 = arith.constant 0 : index
    %562 = vector.load %arg7[%561, %c0_161] : memref<64x32xf32, #tpu.memory_space<vmem>>, vector<8x32xf32>
    tpu.vector_store %arg7[%561, %c0_161], %560 {strides = array<i32>} : memref<64x32xf32, #tpu.memory_space<vmem>>, vector<8x32xf32>,
    %c8_i32_162 = arith.constant 8 : i32
    %c1_163 = arith.constant 1 : index
    %c0_164 = arith.constant 0 : index
    %c0_165 = arith.constant 0 : index
    %563 = vector.load %arg8[%c1_163, %c0_164, %c0_165] : memref<2x8x32xf32, #tpu.memory_space<vmem>>, vector<1x8x32xf32>
    %564 = vector.shape_cast %563 : vector<1x8x32xf32> to vector<8x32xf32>
    %565 = vector.shape_cast %560 : vector<8x32xf32> to vector<1x8x32xf32>
    tpu.vector_store %arg8[%c1_163, %c0_164, %c0_165], %565 {strides = array<i32>} : memref<2x8x32xf32, #tpu.memory_space<vmem>>, vector<1x8x32xf32>,
    %c1_166 = arith.constant 1 : index
    %c0_167 = arith.constant 0 : index
    %c0_168 = arith.constant 0 : index
    %566 = vector.load %arg9[%c1_166, %c0_167, %c0_168] : memref<2x8x32xf32, #tpu.memory_space<vmem>>, vector<1x8x32xf32>
    %567 = vector.shape_cast %566 : vector<1x8x32xf32> to vector<8x32xf32>
    %568 = vector.shape_cast %558 : vector<8x32xf32> to vector<1x8x32xf32>
    tpu.vector_store %arg9[%c1_166, %c0_167, %c0_168], %568 {strides = array<i32>} : memref<2x8x32xf32, #tpu.memory_space<vmem>>, vector<1x8x32xf32>,
    return
  }
}

</mosaic_0001>

<bundles_post_ra>
// kernel: tpu_custom_call.1
= control target key start
LH: loop header
LB: loop body
LE: loop exit
PB: predicated region body
PF: predicated region fallthrough
CT: control target
= control target key end

     0   :  { %15 = vsyncpa [#allocation4], 0  ;;  %s3399_s0 = inlined_call_operand.vmem [shape: f32[64,32], index: 0, kind: input, shape index: {}]   ;;  %s3400_s1 = inlined_call_operand.vmem [shape: f32[32,128], index: 1, kind: input, shape index: {}]   ;;  %s3401_s2 = inlined_call_operand.hbm [shape: f32[1,32,128], index: 2, kind: input, shape index: {}]   ;;  %s3402_s3 = inlined_call_operand.vmem [shape: f32[2,32,128], index: 3, kind: input, shape index: {}]   ;;  %s3403_s4 = inlined_call_operand.vmem [shape: f32[2,1,128], index: 4, kind: input, shape index: {}]   ;;  %s3404_s5 = inlined_call_operand.vmem [shape: f32[2,8,32], index: 5, kind: input, shape index: {}]   ;;  %s3405_s6 = inlined_call_operand.hbm [shape: f32[2,8,32], index: 6, kind: input, shape index: {}]   ;;  %s3406_s7 = inlined_call_operand.vmem [shape: f32[64,32], index: 7, kind: output, shape index: {0}]   ;;  %s3407_s8 = inlined_call_operand.hbm [shape: f32[2,8,32], index: 8, kind: output, shape index: {1}]   ;;  %s3408_s9 = inlined_call_operand.hbm [shape: f32[2,8,32], index: 9, kind: output, shape index: {2}]  }
   0x1   :  { %16 = vsyncpa [#allocation7], 0 }
   0x2   :  { %17 = vsyncpa [#allocation5], 0 }
   0x3   :  { %18 = vsyncpa [#allocation10], 0  ;;  %s2850_s30 = smov [#allocation3]   ;;  %s2754_s13 = scalar_lea.hbm %s3401_s2, 512 }
   0x4   :  { %s28_s10 = sshll.u32 %s2850_s30, 4  ;;  %p2755_p0 = scmp.ne.s32.totalorder %s3401_s2, %s2754_s13  ;;  %s29_s10 = int_to_ptr.vmem [resolvable:$true] %s28_s10 }
   0x5   :  { %p2758_p1 = scmp.lt.u32.totalorder %s2754_s13, %s3401_s2 }
   0x7   :  { %p2760_p2 = pnand %p2758_p1, %p2755_p0 }
   0x9   :  { %2763 = shalt.err (!%p2760_p2)
}
   0xa   :  { %s2764_s18 = scalar_lea.vmem %s29_s10, 512  ;;  %p2769_p4 = scmp.lt.s32.totalorder %s29_s10, %s29_s10 }
   0xb   :  { %p2765_p3 = scmp.ne.s32.totalorder %s29_s10, %s2764_s18  ;;  %p2770_p5 = scmp.lt.s32.totalorder %s2764_s18, %s2764_s18 }
   0xd   :  { %p2771_p6 = por %p2770_p5, %p2769_p4 }
   0xf   :  { %p2772_p7 = pnand %p2771_p6, %p2765_p3 }
  0x11   :  { %2775 = shalt.err (!%p2772_p7)
}
  0x12   :  { %s2851_s19 = smov 128   ;;  %s2852_s20 = smov 8  }
  0x13   :  { %34 = dma.hbm_to_vmem [thread:$0]  %s3401_s2, 512, %s29_s10, [#allocation4], %s2851_s19, %s2851_s19, %s2852_s20  }
  0x14   :  { %s2853_s23 = smov [#allocation6]   ;;  %s2776_s27 = scalar_lea.hbm %s3405_s6, 256 }
  0x15   :  { %s46_s24 = sshll.u32 %s2853_s23, 4  ;;  %p2777_p8 = scmp.ne.s32.totalorder %s3405_s6, %s2776_s27  ;;  %s47_s24 = int_to_ptr.vmem [resolvable:$true] %s46_s24 }
  0x16   :  { %p2780_p9 = scmp.lt.u32.totalorder %s2776_s27, %s3405_s6 }
  0x18   :  { %p2782_p10 = pnand %p2780_p9, %p2777_p8 }
  0x1a   :  { %2785 = shalt.err (!%p2782_p10)
}
  0x1b   :  { %s2786_s12 = scalar_lea.vmem %s47_s24, 256  ;;  %p2791_p12 = scmp.lt.s32.totalorder %s47_s24, %s47_s24 }
  0x1c   :  { %p2787_p11 = scmp.ne.s32.totalorder %s47_s24, %s2786_s12  ;;  %p2792_p13 = scmp.lt.s32.totalorder %s2786_s12, %s2786_s12 }
  0x1e   :  { %p2793_p0 = por %p2792_p13, %p2791_p12 }
  0x20   :  { %p2794_p1 = pnand %p2793_p0, %p2787_p11 }
  0x22   :  { %2797 = shalt.err (!%p2794_p1)
}
  0x23   :  { %52 = dma.hbm_to_vmem [thread:$0]  %s3405_s6, 256, %s47_s24, [#allocation7], %s2851_s19, %s2851_s19, %s2852_s20  }
  0x24   :  { %2842 = dma.done.wait [#allocation4], 512  }
  0x25   :  { %2843 = vsyncadd [#allocation4], 4294966784 }
  0x26   :  { %2844 = dma.done.wait [#allocation7], 256  }
  0x27   :  { %2845 = vsyncadd [#allocation7], 4294967040  ;;  %v2854_v0 = vmov 0.0|0.0   ;;  %vm2855_vm0 = vmmov 0   ;;  %v2856_v1 = vmov 0.0   ;;  %v67_v2 = vld [vmem:[%s3400_s1] sm:$0xff] }
  0x28   :  { %2510 = vmatprep.subr.bf16.mxu1 %v2854_v0  ;;  %2314 = vmatprep.mubr.msk.f32.mxu1 %vm2855_vm0, %v2856_v1  ;;  %v68_v3 = vld [vmem:[%s3400_s1 + $0x8] sm:$0xff]  ;;  %v216_v4 = vld [vmem:[%s3402_s3] sm:$0xff]  ;;  %vm78_vm1 = vcmask 261120   ;;  %v69_v7 = vld [vmem:[%s3400_s1 + $0x10] sm:$0xff]  ;;  %s2857_s15 = smov 64   ;;  %s2858_s16 = smov 32  }
  0x29   :  { %v2502_v5 = vpack.c.bf16 %v68_v3, %v67_v2  ;;  %v217_v6 = vld [vmem:[%s3402_s3 + $0x8] sm:$0xff]  ;;  %v70_v8 = vld [vmem:[%s3400_s1 + $0x18] sm:$0xff]  ;;  %v59_v11 = vld [vmem:[%s3399_s0] sm:$0xff]  ;;  %s2860_s22 = smov [#allocation9]  }
  0x2a   :  { %v2963_v9 = vpack.c.bf16 %v217_v6, %v216_v4  ;;  %v2506_v10 = vpack.c.bf16 %v70_v8, %v69_v7  ;;  %v218_v12 = vld [vmem:[%s3402_s3 + $0x10] sm:$0xff]  ;;  %v219_v13 = vld [vmem:[%s3402_s3 + $0x18] sm:$0xff]  ;;  %2294 = vmatprep.mubr.msk.f32.mxu0 %vm78_vm1, %v59_v11  ;;  %v60_v15 = vld [vmem:[%s3399_s0 + $0x8] sm:$0xff]  ;;  %s2093_s23 = sshll.u32 %s2860_s22, 4  ;;  %s2094_s23 = int_to_ptr.vmem [resolvable:$true] %s2093_s23 }
  0x2b   :  { %2503 = vmatprep.subr.bf16.mxu0 %v2502_v5  ;;  %v2976_v14 = vpack.c.bf16 %v219_v13, %v218_v12  ;;  %v220_v16 = vld [vmem:[%s3404_s5] sm:$0xff]  ;;  %v61_v54 = vld [vmem:[%s3399_s0 + $0x10] sm:$0xff]  ;;  %v62_v55 = vld [vmem:[%s3399_s0 + $0x18] sm:$0xff]  ;;  %s2798_s24 = scalar_lea.vmem %s2094_s23, 256  ;;  %p2803_p3 = scmp.lt.s32.totalorder %s2094_s23, %s2094_s23 }
  0x2c   :  { %2505 = vmatpush3.bf16.msra.mxu0 %v2502_v5  ;;  %2512 = vmatpush3.bf16.msra.mxu1 %v2963_v9  ;;  %v3003_v17 = vld [vmem:[%s3403_s4] ss:$0 sm:$0xff]  ;;  %v64_v57 = vld [vmem:[%s3399_s0 + $0x28] sm:$0xff]  ;;  %v65_v58 = vld [vmem:[%s3399_s0 + $0x30] sm:$0xff]  ;;  %p2799_p2 = scmp.ne.s32.totalorder %s2094_s23, %s2798_s24  ;;  %p2804_p4 = scmp.lt.s32.totalorder %s2798_s24, %s2798_s24 }
  0x2d   :  { %2507 = vmatprep.subr.bf16.mxu0 %v2506_v10  ;;  %2513 = vmatprep.subr.bf16.mxu1 %v2854_v0  ;;  %v221_v25 = vld [vmem:[#allocation6] sm:$0xff]  ;;  %v66_v59 = vld [vmem:[%s3399_s0 + $0x38] sm:$0xff] }
  0x2e   :  { %v63_v56 = vld [vmem:[%s3399_s0 + $0x20] sm:$0xff]  ;;  %p2805_p5 = por %p2804_p4, %p2803_p3 }
  0x30   :  { %2509 = vmatpush3.bf16.msra.mxu0 %v2506_v10  ;;  %2515 = vmatpush3.bf16.msra.mxu1 %v2976_v14  ;;  %p2806_p6 = pnand %p2805_p5, %p2799_p2 }
  0x31   :  { %2516 = vmatprep.subr.bf16.mxu1 %v2854_v0  ;;  %2522 = vmatprep.subr.bf16.mxu0 %v2854_v0 }
  0x33   :  { %2295 = vmatmul.mubr.msk.f32.vlgmr.msra.gmra.mrb[0].mxu0 %vm78_vm1, %v60_v15  ;;  %2315 = vmatmul.mubr.msk.f32.vlgmr.msra.gmra.mrb[0].mxu1 %vm78_vm1, %v220_v16 }
  0x34   :  { %2518 = vmatpush3.bf16.msra.mxu1 %v2963_v9  ;;  %2325 = vmatprep.mubr.msk.f32.mxu1 %vm2855_vm0, %v2856_v1 }
  0x35   :  { %2519 = vmatprep.subr.bf16.mxu1 %v2854_v0  ;;  %2524 = vmatpush3.bf16.msra.mxu0 %v2963_v9 }
  0x36   :  { %2525 = vmatprep.subr.bf16.mxu0 %v2854_v0  ;;  %2297 = vmatprep.mubr.msk.f32.mxu0 %vm78_vm1, %v61_v54 }
  0x37   :  { %2298 = vmatmul.mubr.msk.f32.gmra.mrb[2].mxu0 %vm78_vm1, %v62_v55 }
  0x38   :  { %2521 = vmatpush3.bf16.msra.mxu1 %v2976_v14  ;;  %2300 = vmatprep.mubr.msk.f32.mxu0 %vm78_vm1, %v63_v56 }
  0x39   :  { %2527 = vmatpush3.bf16.msra.mxu0 %v2976_v14  ;;  %2528 = vmatprep.subr.bf16.mxu1 %v2854_v0 }
  0x3a   :  { %2534 = vmatprep.subr.bf16.mxu0 %v2854_v0 }
  0x3b   :  { %2301 = vmatmul.mubr.msk.f32.gmra.mrb[4].mxu0 %vm78_vm1, %v64_v57 }
  0x3c   :  { %2303 = vmatprep.mubr.msk.f32.mxu0 %vm78_vm1, %v65_v58 }
  0x3f   :  { %2304 = vmatmul.mubr.msk.f32.gmra.mrb[6].mxu0 %vm78_vm1, %v66_v59 }
  0x40   :  { %2336 = vmatprep.mubr.msk.f32.mxu0 %vm2855_vm0, %v2856_v1 }
 0x106   :  { %v2296_v18 = vpop.f32.mrb[0].mxu0  ;;  %v292_v19 = vpop.f32.mrb[0].mxu1 }
 0x107   :  { %v169_v20 = vpop.f32.mrb[1].mxu0  ;;  %v2316_v21 = vpop.f32.mrb[1].mxu1  ;;  %v175_v40 = vadd.f32 %v2296_v18, %v3003_v17 }
 0x108   :  { %v170_v22 = vadd.f32 %v3003_v17, %v169_v20 }
 0x10a   :  { %v296_v23 = vadd.f32 %v292_v19, %v170_v22  ;;  %v2299_v63 = vpop.f32.mrb[2].mxu0 }
 0x10b   :  { %v179_v2 = vpop.f32.mrb[3].mxu0 }
 0x10c   :  { %2626 = vtanh.f32 %v296_v23  ;;  %v2122_v26 = vmul.f32 -1.442695, %v296_v23  ;;  %v180_v8 = vadd.f32 %v3003_v17, %v179_v2 }
 0x10e   :  { %2628 = vpow2.f32 %v2122_v26  ;;  %v3053_v3 = vpop.f32.mrb[4].mxu0 }
 0x10f   :  { %v3055_v4 = vpop.f32.mrb[5].mxu0 }
 0x112   :  { %v3057_v5 = vpop.f32.mrb[6].mxu0 }
 0x113   :  { %v3059_v6 = vpop.f32.mrb[7].mxu0 }
 0x116   :  { %v2627_v24 = vpop.eup %2626 }
 0x117   :  { %310 = vrot.lane.b32.xlu0 %v2627_v24, %s2857_s15 }
 0x118   :  { %v2629_v27 = vpop.eup %2628 }
 0x119   :  { %v300_v28 = vadd.f32 1.0, %v2629_v27 }
 0x11b   :  { %305 = vrot.lane.b32.xlu0 %v221_v25, %s2858_s16  ;;  %2630 = vrcp.f32 %v300_v28 }
 0x125   :  { %v2631_v29 = vpop.eup %2630 }
 0x189   :  { %v311_v30 = vpop.permute.xlu0 %310 }
 0x18a   :  { %v313_v31 = vmul.f32 %v2631_v29, %v311_v30 }
 0x18c   :  { %315 = vrot.lane.b32.xlu1 %v313_v31, %s2858_s16 }
 0x18d   :  { %v306_v32 = vpop.permute.xlu0 %305 }
 0x18e   :  { %v308_v33 = vmul.f32 %v2631_v29, %v306_v32 }
 0x1fe   :  { %v316_v34 = vpop.permute.xlu1 %315 }
 0x1ff   :  { %v318_v35 = vadd.f32 %v316_v34, %v308_v33 }
 0x201   :  { %2632 = vtanh.f32 %v318_v35 }
 0x20b   :  { %v2633_v36 = vpop.eup %2632 }
 0x20c   :  { %321 = vrot.lane.b32.xlu1 %v2633_v36, %s2857_s15 }
 0x27e   :  { %v322_v37 = vpop.permute.xlu1 %321 }
 0x27f   :  { %v324_v38 = vmul.f32 %v2631_v29, %v322_v37  ;;  %v185_v29 = vadd.f32 %v2299_v63, %v3003_v17 }
 0x281   :  { %326 = vrot.lane.b32.xlu0 %v324_v38, %s2858_s16 }
 0x2f3   :  { %v327_v39 = vpop.permute.xlu0 %326 }
 0x2f4   :  { %329 = vst.msk [vmem:[%s3406_s7] sm:$0xff] %vm78_vm1, %v327_v39  ;;  %2326 = vmatmul.mubr.msk.f32.vlgmr.msra.gmra.mrb[2].mxu1 %vm78_vm1, %v327_v39 }
 0x2f5   :  { %2530 = vmatpush3.bf16.msra.mxu1 %v2963_v9  ;;  %2347 = vmatprep.mubr.msk.f32.mxu1 %vm2855_vm0, %v2856_v1 }
 0x2f6   :  { %2531 = vmatprep.subr.bf16.mxu1 %v2854_v0 }
 0x2f9   :  { %2533 = vmatpush3.bf16.msra.mxu1 %v2976_v14 }
 0x2fa   :  { %2540 = vmatprep.subr.bf16.mxu1 %v2854_v0 }
 0x3c7   :  { %v400_v41 = vpop.f32.mrb[2].mxu1 }
 0x3c8   :  { %v404_v42 = vadd.f32 %v400_v41, %v175_v40  ;;  %v2327_v43 = vpop.f32.mrb[3].mxu1 }
 0x3ca   :  { %2634 = vtanh.f32 %v404_v42  ;;  %v2124_v45 = vmul.f32 -1.442695, %v404_v42 }
 0x3cc   :  { %2636 = vpow2.f32 %v2124_v45 }
 0x3d4   :  { %v2635_v44 = vpop.eup %2634 }
 0x3d5   :  { %414 = vrot.lane.b32.xlu1 %v2635_v44, %s2857_s15 }
 0x3d6   :  { %v2637_v46 = vpop.eup %2636 }
 0x3d7   :  { %v408_v47 = vadd.f32 1.0, %v2637_v46 }
 0x3d9   :  { %2638 = vrcp.f32 %v408_v47  ;;  %v190_v47 = vadd.f32 %v3003_v17, %v3055_v4  ;;  %v195_v4 = vadd.f32 %v3053_v3, %v3003_v17 }
 0x3e3   :  { %v2639_v48 = vpop.eup %2638 }
 0x3e4   :  { %v412_v51 = vmul.f32 %v2639_v48, %v318_v35 }
 0x447   :  { %v415_v49 = vpop.permute.xlu1 %414 }
 0x448   :  { %v417_v50 = vmul.f32 %v2639_v48, %v415_v49 }
 0x44a   :  { %419 = vrot.lane.b32.xlu0 %v417_v50, %s2858_s16 }
 0x4bc   :  { %v420_v52 = vpop.permute.xlu0 %419 }
 0x4bd   :  { %v422_v53 = vadd.f32 %v420_v52, %v412_v51 }
 0x4bf   :  { %2640 = vtanh.f32 %v422_v53 }
 0x4c9   :  { %v2641_v60 = vpop.eup %2640 }
 0x4ca   :  { %425 = vrot.lane.b32.xlu1 %v2641_v60, %s2857_s15 }
 0x53c   :  { %v426_v61 = vpop.permute.xlu1 %425 }
 0x53d   :  { %v428_v62 = vmul.f32 %v2639_v48, %v426_v61 }
 0x53f   :  { %430 = vrot.lane.b32.xlu0 %v428_v62, %s2858_s16 }
 0x5b1   :  { %v431_v7 = vpop.permute.xlu0 %430 }
 0x5b2   :  { %2125 = vst.msk [vmem:[%s3406_s7 + $0x8] sm:$0xff] %vm78_vm1, %v431_v7  ;;  %2337 = vmatmul.mubr.msk.f32.vlgmr.msra.gmra.mrb[8].mxu0 %vm78_vm1, %v431_v7 }
 0x5b3   :  { %2536 = vmatpush3.bf16.msra.mxu0 %v2963_v9  ;;  %2358 = vmatprep.mubr.msk.f32.mxu0 %vm2855_vm0, %v2856_v1 }
 0x5b4   :  { %2537 = vmatprep.subr.bf16.mxu0 %v2854_v0 }
 0x5b7   :  { %2539 = vmatpush3.bf16.msra.mxu0 %v2976_v14 }
 0x5b8   :  { %2546 = vmatprep.subr.bf16.mxu0 %v2854_v0 }
 0x685   :  { %v505_v10 = vpop.f32.mrb[8].mxu0 }
 0x686   :  { %v509_v11 = vadd.f32 %v505_v10, %v180_v8  ;;  %v2338_v12 = vpop.f32.mrb[9].mxu0 }
 0x688   :  { %2642 = vtanh.f32 %v509_v11  ;;  %v2127_v15 = vmul.f32 -1.442695, %v509_v11 }
 0x68a   :  { %2644 = vpow2.f32 %v2127_v15 }
 0x692   :  { %v2643_v13 = vpop.eup %2642 }
 0x693   :  { %519 = vrot.lane.b32.xlu1 %v2643_v13, %s2857_s15 }
 0x694   :  { %v2645_v16 = vpop.eup %2644 }
 0x695   :  { %v513_v18 = vadd.f32 1.0, %v2645_v16 }
 0x697   :  { %2646 = vrcp.f32 %v513_v18 }
 0x6a1   :  { %v2647_v19 = vpop.eup %2646 }
 0x6a2   :  { %v517_v22 = vmul.f32 %v2647_v19, %v422_v53 }
 0x705   :  { %v520_v20 = vpop.permute.xlu1 %519 }
 0x706   :  { %v522_v21 = vmul.f32 %v2647_v19, %v520_v20  ;;  %v1079_v20 = vld [vmem:[#allocation3] sm:$0xff] }
 0x708   :  { %524 = vrot.lane.b32.xlu0 %v522_v21, %s2858_s16  ;;  %v1080_v21 = vld [vmem:[#allocation3 + $0x8] sm:$0xff] }
 0x77a   :  { %v525_v23 = vpop.permute.xlu0 %524 }
 0x77b   :  { %v527_v24 = vadd.f32 %v525_v23, %v517_v22  ;;  %v2558_v22 = vpack.c.bf16 %v1080_v21, %v1079_v20 }
 0x77d   :  { %2648 = vtanh.f32 %v527_v24 }
 0x787   :  { %v2649_v25 = vpop.eup %2648 }
 0x788   :  { %530 = vrot.lane.b32.xlu1 %v2649_v25, %s2857_s15 }
 0x7fa   :  { %v531_v26 = vpop.permute.xlu1 %530 }
 0x7fb   :  { %v533_v27 = vmul.f32 %v2647_v19, %v531_v26  ;;  %v1081_v26 = vld [vmem:[#allocation3 + $0x10] sm:$0xff] }
 0x7fd   :  { %535 = vrot.lane.b32.xlu0 %v533_v27, %s2858_s16  ;;  %v1082_v27 = vld [vmem:[#allocation3 + $0x18] sm:$0xff] }
 0x86f   :  { %v536_v28 = vpop.permute.xlu0 %535 }
 0x870   :  { %2128 = vst.msk [vmem:[%s3406_s7 + $0x10] sm:$0xff] %vm78_vm1, %v536_v28  ;;  %2348 = vmatmul.mubr.msk.f32.vlgmr.msra.gmra.mrb[4].mxu1 %vm78_vm1, %v536_v28  ;;  %v2562_v28 = vpack.c.bf16 %v1082_v27, %v1081_v26 }
 0x871   :  { %2542 = vmatpush3.bf16.msra.mxu1 %v2963_v9  ;;  %2369 = vmatprep.mubr.msk.f32.mxu1 %vm2855_vm0, %v2856_v1 }
 0x872   :  { %2543 = vmatprep.subr.bf16.mxu1 %v2854_v0 }
 0x875   :  { %2545 = vmatpush3.bf16.msra.mxu1 %v2976_v14 }
 0x876   :  { %2552 = vmatprep.subr.bf16.mxu1 %v2854_v0 }
 0x943   :  { %v610_v30 = vpop.f32.mrb[4].mxu1 }
 0x944   :  { %v614_v31 = vadd.f32 %v610_v30, %v185_v29  ;;  %v2349_v32 = vpop.f32.mrb[5].mxu1  ;;  %v1071_v30 = vld [vmem:[%s3406_s7] sm:$0xff] }
 0x945   :  { %v1073_v32 = vld [vmem:[%s3406_s7 + $0x10] sm:$0xff] }
 0x946   :  { %2650 = vtanh.f32 %v614_v31  ;;  %v2130_v34 = vmul.f32 -1.442695, %v614_v31  ;;  %v1072_v31 = vld [vmem:[%s3406_s7 + $0x8] sm:$0xff] }
 0x948   :  { %2652 = vpow2.f32 %v2130_v34 }
 0x950   :  { %v2651_v33 = vpop.eup %2650 }
 0x951   :  { %624 = vrot.lane.b32.xlu1 %v2651_v33, %s2857_s15 }
 0x952   :  { %v2653_v35 = vpop.eup %2652 }
 0x953   :  { %v618_v36 = vadd.f32 1.0, %v2653_v35 }
 0x955   :  { %2654 = vrcp.f32 %v618_v36  ;;  %v200_v36 = vadd.f32 %v3003_v17, %v3059_v6 }
 0x95f   :  { %v2655_v37 = vpop.eup %2654 }
 0x960   :  { %v622_v40 = vmul.f32 %v2655_v37, %v527_v24 }
 0x9c3   :  { %v625_v38 = vpop.permute.xlu1 %624 }
 0x9c4   :  { %v627_v39 = vmul.f32 %v2655_v37, %v625_v38 }
 0x9c6   :  { %629 = vrot.lane.b32.xlu0 %v627_v39, %s2858_s16 }
 0xa38   :  { %v630_v41 = vpop.permute.xlu0 %629 }
 0xa39   :  { %v632_v42 = vadd.f32 %v630_v41, %v622_v40 }
 0xa3b   :  { %2656 = vtanh.f32 %v632_v42 }
 0xa45   :  { %v2657_v43 = vpop.eup %2656 }
 0xa46   :  { %635 = vrot.lane.b32.xlu1 %v2657_v43, %s2857_s15 }
 0xab8   :  { %v636_v44 = vpop.permute.xlu1 %635 }
 0xab9   :  { %v638_v45 = vmul.f32 %v2655_v37, %v636_v44 }
 0xabb   :  { %640 = vrot.lane.b32.xlu0 %v638_v45, %s2858_s16 }
 0xb2d   :  { %v641_v46 = vpop.permute.xlu0 %640 }
 0xb2e   :  { %2131 = vst.msk [vmem:[%s3406_s7 + $0x18] sm:$0xff] %vm78_vm1, %v641_v46  ;;  %2359 = vmatmul.mubr.msk.f32.vlgmr.msra.gmra.mrb[10].mxu0 %vm78_vm1, %v641_v46 }
 0xb2f   :  { %2548 = vmatpush3.bf16.msra.mxu0 %v2963_v9  ;;  %2380 = vmatprep.mubr.msk.f32.mxu0 %vm2855_vm0, %v2856_v1 }
 0xb30   :  { %2549 = vmatprep.subr.bf16.mxu0 %v2854_v0 }
 0xb33   :  { %2551 = vmatpush3.bf16.msra.mxu0 %v2976_v14 }
 0xb34   :  { %2559 = vmatprep.subr.bf16.mxu0 %v2558_v22 }
 0xb35   :  { %v1074_v33 = vld [vmem:[%s3406_s7 + $0x18] sm:$0xff] }
 0xc01   :  { %v715_v48 = vpop.f32.mrb[10].mxu0 }
 0xc02   :  { %v719_v49 = vadd.f32 %v715_v48, %v190_v47  ;;  %v2360_v50 = vpop.f32.mrb[11].mxu0 }
 0xc04   :  { %2658 = vtanh.f32 %v719_v49  ;;  %v2133_v52 = vmul.f32 -1.442695, %v719_v49 }
 0xc06   :  { %2660 = vpow2.f32 %v2133_v52 }
 0xc0e   :  { %v2659_v51 = vpop.eup %2658 }
 0xc0f   :  { %729 = vrot.lane.b32.xlu1 %v2659_v51, %s2857_s15 }
 0xc10   :  { %v2661_v53 = vpop.eup %2660 }
 0xc11   :  { %v723_v54 = vadd.f32 1.0, %v2661_v53 }
 0xc13   :  { %2662 = vrcp.f32 %v723_v54 }
 0xc1d   :  { %v2663_v55 = vpop.eup %2662 }
 0xc1e   :  { %v727_v58 = vmul.f32 %v2663_v55, %v632_v42 }
 0xc81   :  { %v730_v56 = vpop.permute.xlu1 %729 }
 0xc82   :  { %v732_v57 = vmul.f32 %v2663_v55, %v730_v56  ;;  %v2154_v56 = vld [vmem:[%s3402_s3 + $0x20] sm:$0xff] }
 0xc84   :  { %734 = vrot.lane.b32.xlu0 %v732_v57, %s2858_s16  ;;  %v2155_v57 = vld [vmem:[%s3402_s3 + $0x28] sm:$0xff] }
 0xcf6   :  { %v735_v59 = vpop.permute.xlu0 %734 }
 0xcf7   :  { %v737_v60 = vadd.f32 %v735_v59, %v727_v58  ;;  %v3180_v58 = vpack.c.bf16 %v2155_v57, %v2154_v56  ;;  %v2156_v59 = vld [vmem:[%s3402_s3 + $0x30] sm:$0xff] }
 0xcf9   :  { %2664 = vtanh.f32 %v737_v60 }
 0xd03   :  { %v2665_v61 = vpop.eup %2664 }
 0xd04   :  { %740 = vrot.lane.b32.xlu1 %v2665_v61, %s2857_s15 }
 0xd76   :  { %v741_v62 = vpop.permute.xlu1 %740 }
 0xd77   :  { %v743_v63 = vmul.f32 %v2663_v55, %v741_v62 }
 0xd79   :  { %745 = vrot.lane.b32.xlu0 %v743_v63, %s2858_s16 }
 0xdeb   :  { %v746_v2 = vpop.permute.xlu0 %745 }
 0xdec   :  { %2134 = vst.msk [vmem:[%s3406_s7 + $0x20] sm:$0xff] %vm78_vm1, %v746_v2  ;;  %2370 = vmatmul.mubr.msk.f32.vlgmr.msra.gmra.mrb[6].mxu1 %vm78_vm1, %v746_v2  ;;  %v1236_v2 = vld [vmem:[#allocation6 + $0x8] sm:$0xff] }
 0xded   :  { %2554 = vmatpush3.bf16.msra.mxu1 %v2963_v9  ;;  %2391 = vmatprep.mubr.msk.f32.mxu1 %vm2855_vm0, %v2856_v1 }
 0xdee   :  { %2555 = vmatprep.subr.bf16.mxu1 %v2854_v0 }
 0xdf1   :  { %2557 = vmatpush3.bf16.msra.mxu1 %v2976_v14 }
 0xdf2   :  { %2566 = vmatprep.subr.bf16.mxu1 %v2854_v0 }
 0xdf3   :  { %v1075_v34 = vld [vmem:[%s3406_s7 + $0x20] sm:$0xff] }
 0xebf   :  { %v820_v7 = vpop.f32.mrb[6].mxu1 }
 0xec0   :  { %v824_v8 = vadd.f32 %v820_v7, %v195_v4  ;;  %v2371_v10 = vpop.f32.mrb[7].mxu1  ;;  %v2158_v7 = vld [vmem:[%s3404_s5 + $0x8] sm:$0xff] }
 0xec1   :  { %v205_v10 = vadd.f32 %v3057_v5, %v3003_v17 }
 0xec2   :  { %2666 = vtanh.f32 %v824_v8  ;;  %v2136_v9 = vmul.f32 -1.442695, %v824_v8 }
 0xec4   :  { %2668 = vpow2.f32 %v2136_v9 }
 0xecc   :  { %v2667_v11 = vpop.eup %2666 }
 0xecd   :  { %834 = vrot.lane.b32.xlu1 %v2667_v11, %s2857_s15 }
 0xece   :  { %v2669_v12 = vpop.eup %2668 }
 0xecf   :  { %v828_v13 = vadd.f32 1.0, %v2669_v12 }
 0xed1   :  { %2670 = vrcp.f32 %v828_v13  ;;  %v3226_v13 = vld [vmem:[%s3403_s4 + $0x1] ss:$0 sm:$0xff] }
 0xedb   :  { %v2671_v15 = vpop.eup %2670 }
 0xedc   :  { %v832_v18 = vmul.f32 %v2671_v15, %v737_v60  ;;  %v2157_v60 = vld [vmem:[%s3402_s3 + $0x38] sm:$0xff]  ;;  %s2859_s3 = smov 96  }
 0xedd   :  { %v3190_v61 = vpack.c.bf16 %v2157_v60, %v2156_v59 }
 0xf3f   :  { %v835_v16 = vpop.permute.xlu1 %834 }
 0xf40   :  { %v837_v14 = vmul.f32 %v2671_v15, %v835_v16 }
 0xf42   :  { %839 = vrot.lane.b32.xlu0 %v837_v14, %s2858_s16 }
 0xfb4   :  { %v840_v19 = vpop.permute.xlu0 %839 }
 0xfb5   :  { %v842_v3 = vadd.f32 %v840_v19, %v832_v18 }
 0xfb7   :  { %2672 = vtanh.f32 %v842_v3 }
 0xfc1   :  { %v2673_v23 = vpop.eup %2672 }
 0xfc2   :  { %845 = vrot.lane.b32.xlu1 %v2673_v23, %s2857_s15 }
0x1034   :  { %v846_v24 = vpop.permute.xlu1 %845 }
0x1035   :  { %v848_v25 = vmul.f32 %v2671_v15, %v846_v24 }
0x1037   :  { %850 = vrot.lane.b32.xlu0 %v848_v25, %s2858_s16 }
0x10a9   :  { %v851_v29 = vpop.permute.xlu0 %850 }
0x10aa   :  { %2137 = vst.msk [vmem:[%s3406_s7 + $0x28] sm:$0xff] %vm78_vm1, %v851_v29  ;;  %2381 = vmatmul.mubr.msk.f32.vlgmr.msra.gmra.mrb[12].mxu0 %vm78_vm1, %v851_v29 }
0x10ab   :  { %2561 = vmatpush3.bf16.msra.mxu0 %v2558_v22  ;;  %2402 = vmatprep.mubr.msk.f32.mxu0 %vm78_vm1, %v1071_v30 }
0x10ac   :  { %2563 = vmatprep.subr.bf16.mxu0 %v2562_v28 }
0x10af   :  { %2565 = vmatpush3.bf16.msra.mxu0 %v2562_v28 }
0x10b0   :  { %2578 = vmatprep.subr.bf16.mxu0 %v2854_v0 }
0x10b1   :  { %v1076_v35 = vld [vmem:[%s3406_s7 + $0x28] sm:$0xff] }
0x10b2   :  { %2403 = vmatmul.mubr.msk.f32.vlgmr.msra.gmra.mrb[14].mxu0 %vm78_vm1, %v1072_v31 }
0x10b3   :  { %2405 = vmatprep.mubr.msk.f32.mxu0 %vm78_vm1, %v1073_v32  ;;  %2580 = vmatpush3.bf16.msra.mxu0 %v3180_v58 }
0x10b4   :  { %2581 = vmatprep.subr.bf16.mxu0 %v2854_v0 }
0x10b6   :  { %2406 = vmatmul.mubr.msk.f32.gmra.mrb[16].mxu0 %vm78_vm1, %v1074_v33 }
0x10b7   :  { %2408 = vmatprep.mubr.msk.f32.mxu0 %vm78_vm1, %v1075_v34  ;;  %2583 = vmatpush3.bf16.msra.mxu0 %v3190_v61 }
0x10b8   :  { %2590 = vmatprep.subr.bf16.mxu0 %v2854_v0 }
0x10ba   :  { %2409 = vmatmul.mubr.msk.f32.gmra.mrb[18].mxu0 %vm78_vm1, %v1076_v35 }
0x117d   :  { %v925_v37 = vpop.f32.mrb[12].mxu0 }
0x117e   :  { %v929_v38 = vadd.f32 %v925_v37, %v200_v36  ;;  %v2382_v39 = vpop.f32.mrb[13].mxu0 }
0x1180   :  { %2674 = vtanh.f32 %v929_v38  ;;  %v2139_v47 = vmul.f32 -1.442695, %v929_v38 }
0x1182   :  { %2676 = vpow2.f32 %v2139_v47 }
0x1185   :  { %v3158_v40 = vpop.f32.mrb[14].mxu0 }
0x1186   :  { %v1181_v41 = vpop.f32.mrb[15].mxu0 }
0x1187   :  { %v1182_v15 = vadd.f32 %v3226_v13, %v1181_v41 }
0x1189   :  { %v3160_v42 = vpop.f32.mrb[16].mxu0 }
0x118a   :  { %v2675_v43 = vpop.eup %2674  ;;  %v3162_v44 = vpop.f32.mrb[17].mxu0 }
0x118b   :  { %939 = vrot.lane.b32.xlu1 %v2675_v43, %s2857_s15 }
0x118c   :  { %v2677_v6 = vpop.eup %2676 }
0x118d   :  { %v3165_v45 = vpop.f32.mrb[18].mxu0  ;;  %v933_v48 = vadd.f32 1.0, %v2677_v6 }
0x118e   :  { %v3167_v46 = vpop.f32.mrb[19].mxu0 }
0x118f   :  { %2678 = vrcp.f32 %v933_v48  ;;  %v1187_v48 = vadd.f32 %v3158_v40, %v3226_v13 }
0x1199   :  { %v2679_v49 = vpop.eup %2678 }
0x119a   :  { %v937_v52 = vmul.f32 %v2679_v49, %v842_v3 }
0x11fd   :  { %v940_v50 = vpop.permute.xlu1 %939 }
0x11fe   :  { %v942_v51 = vmul.f32 %v2679_v49, %v940_v50 }
0x1200   :  { %944 = vrot.lane.b32.xlu0 %v942_v51, %s2858_s16 }
0x1272   :  { %v945_v53 = vpop.permute.xlu0 %944 }
0x1273   :  { %v3170_v54 = vadd.f32 %v945_v53, %v937_v52 }
0x1275   :  { %2680 = vtanh.f32 %v3170_v54 }
0x127f   :  { %v2681_v55 = vpop.eup %2680 }
0x1280   :  { %950 = vrot.lane.b32.xlu1 %v2681_v55, %s2857_s15 }
0x12f2   :  { %v951_v62 = vpop.permute.xlu1 %950 }
0x12f3   :  { %v953_v63 = vmul.f32 %v2679_v49, %v951_v62 }
0x12f5   :  { %955 = vrot.lane.b32.xlu0 %v953_v63, %s2858_s16 }
0x12f9   :  { %1320 = vrot.lane.b32.xlu0 %v1236_v2, %s2858_s16 }
0x1367   :  { %v956_v4 = vpop.permute.xlu0 %955 }
0x1368   :  { %2140 = vst.msk [vmem:[%s3406_s7 + $0x30] sm:$0xff] %vm78_vm1, %v956_v4  ;;  %2392 = vmatmul.mubr.msk.f32.vlgmr.msra.gmra.mrb[8].mxu1 %vm78_vm1, %v956_v4 }
0x1369   :  { %2568 = vmatpush3.bf16.msra.mxu1 %v3180_v58  ;;  %2422 = vmatprep.mubr.msk.f32.mxu1 %vm2855_vm0, %v2856_v1 }
0x136a   :  { %2569 = vmatprep.subr.bf16.mxu1 %v2854_v0 }
0x136b   :  { %v1321_v23 = vpop.permute.xlu0 %1320 }
0x136d   :  { %2571 = vmatpush3.bf16.msra.mxu1 %v3190_v61 }
0x136e   :  { %2572 = vmatprep.subr.bf16.mxu1 %v2854_v0 }
0x136f   :  { %v1077_v8 = vld [vmem:[%s3406_s7 + $0x30] sm:$0xff] }
0x1370   :  { %2423 = vmatmul.mubr.msk.f32.vlgmr.msra.gmra.mrb[10].mxu1 %vm78_vm1, %v2158_v7  ;;  %2411 = vmatprep.mubr.msk.f32.mxu0 %vm78_vm1, %v1077_v8 }
0x1371   :  { %2574 = vmatpush3.bf16.msra.mxu1 %v3180_v58  ;;  %2433 = vmatprep.mubr.msk.f32.mxu1 %vm2855_vm0, %v2856_v1 }
0x1372   :  { %2575 = vmatprep.subr.bf16.mxu1 %v2854_v0 }
0x1375   :  { %2577 = vmatpush3.bf16.msra.mxu1 %v3190_v61 }
0x1376   :  { %2584 = vmatprep.subr.bf16.mxu1 %v2854_v0 }
0x143b   :  { %v1030_v11 = vpop.f32.mrb[8].mxu1 }
0x143c   :  { %v1034_v9 = vadd.f32 %v1030_v11, %v205_v10  ;;  %v2393_v12 = vpop.f32.mrb[9].mxu1 }
0x143d   :  { %v1192_v12 = vadd.f32 %v3226_v13, %v3162_v44 }
0x143e   :  { %v2142_v29 = vmul.f32 -1.442695, %v1034_v9 }
0x1443   :  { %v1307_v16 = vpop.f32.mrb[10].mxu1 }
0x1444   :  { %v1311_v14 = vadd.f32 %v1307_v16, %v1182_v15  ;;  %v2424_v18 = vpop.f32.mrb[11].mxu1 }
0x1446   :  { %2682 = vtanh.f32 %v1311_v14  ;;  %v2160_v3 = vmul.f32 -1.442695, %v1311_v14 }
0x1448   :  { %2684 = vpow2.f32 %v2160_v3 }
0x1450   :  { %v2683_v19 = vpop.eup %2682 }
0x1451   :  { %1325 = vrot.lane.b32.xlu1 %v2683_v19, %s2857_s15 }
0x1452   :  { %v2685_v17 = vpop.eup %2684 }
0x1453   :  { %v1315_v5 = vadd.f32 1.0, %v2685_v17 }
0x1455   :  { %2686 = vrcp.f32 %v1315_v5 }
0x145f   :  { %v2687_v20 = vpop.eup %2686 }
0x1460   :  { %v1323_v24 = vmul.f32 %v2687_v20, %v1321_v23 }
0x14c3   :  { %v1326_v21 = vpop.permute.xlu1 %1325 }
0x14c4   :  { %v1328_v22 = vmul.f32 %v2687_v20, %v1326_v21 }
0x14c6   :  { %1330 = vrot.lane.b32.xlu1 %v1328_v22, %s2858_s16 }
0x1538   :  { %v1331_v25 = vpop.permute.xlu1 %1330 }
0x1539   :  { %v1333_v26 = vadd.f32 %v1331_v25, %v1323_v24 }
0x153b   :  { %2688 = vtanh.f32 %v1333_v26 }
0x153c   :  { %2690 = vtanh.f32 %v1034_v9 }
0x153d   :  { %2692 = vpow2.f32 %v2142_v29 }
0x1545   :  { %v2689_v27 = vpop.eup %2688 }
0x1546   :  { %1336 = vrot.lane.b32.xlu0 %v2689_v27, %s2857_s15  ;;  %v2691_v28 = vpop.eup %2690 }
0x1547   :  { %v2693_v30 = vpop.eup %2692 }
0x1548   :  { %v1038_v31 = vadd.f32 1.0, %v2693_v30 }
0x154a   :  { %1044 = vrot.lane.b32.xlu0 %v2691_v28, %s2857_s15  ;;  %2694 = vrcp.f32 %v1038_v31  ;;  %v1197_v28 = vadd.f32 %v3160_v42, %v3226_v13 }
0x1554   :  { %v2695_v34 = vpop.eup %2694 }
0x1555   :  { %v1042_v38 = vmul.f32 %v2695_v34, %v3170_v54 }
0x15b8   :  { %v1337_v32 = vpop.permute.xlu0 %1336 }
0x15b9   :  { %v1339_v33 = vmul.f32 %v2687_v20, %v1337_v32 }
0x15bb   :  { %1341 = vrot.lane.b32.xlu1 %v1339_v33, %s2858_s16 }
0x15bc   :  { %v1045_v35 = vpop.permute.xlu0 %1044 }
0x15bd   :  { %v1047_v36 = vmul.f32 %v2695_v34, %v1045_v35 }
0x15bf   :  { %1049 = vrot.lane.b32.xlu0 %v1047_v36, %s2858_s16 }
0x162d   :  { %v1342_v37 = vpop.permute.xlu1 %1341 }
0x162e   :  { %1344 = vst.msk [vmem:[%s3406_s7] sm:$0xff] %vm78_vm1, %v1342_v37  ;;  %2434 = vmatmul.mubr.msk.f32.vlgmr.msra.gmra.mrb[12].mxu1 %vm78_vm1, %v1342_v37 }
0x162f   :  { %2586 = vmatpush3.bf16.msra.mxu1 %v3180_v58  ;;  %2455 = vmatprep.mubr.msk.f32.mxu1 %vm2855_vm0, %v2856_v1 }
0x1630   :  { %2587 = vmatprep.subr.bf16.mxu1 %v2854_v0 }
0x1631   :  { %v1050_v39 = vpop.permute.xlu0 %1049 }
0x1632   :  { %v3245_v41 = vadd.f32 %v1050_v39, %v1042_v38 }
0x1633   :  { %2589 = vmatpush3.bf16.msra.mxu1 %v3190_v61 }
0x1634   :  { %2696 = vtanh.f32 %v3245_v41  ;;  %2596 = vmatprep.subr.bf16.mxu1 %v2854_v0 }
0x163e   :  { %v2697_v43 = vpop.eup %2696 }
0x163f   :  { %1055 = vrot.lane.b32.xlu0 %v2697_v43, %s2857_s15 }
0x16b1   :  { %v1056_v47 = vpop.permute.xlu0 %1055 }
0x16b2   :  { %v1058_v6 = vmul.f32 %v2695_v34, %v1056_v47 }
0x16b4   :  { %1060 = vrot.lane.b32.xlu0 %v1058_v6, %s2858_s16 }
0x1701   :  { %v1414_v49 = vpop.f32.mrb[12].mxu1 }
0x1702   :  { %v1418_v50 = vadd.f32 %v1414_v49, %v1187_v48  ;;  %v2435_v51 = vpop.f32.mrb[13].mxu1 }
0x1704   :  { %2698 = vtanh.f32 %v1418_v50  ;;  %v2162_v40 = vmul.f32 -1.442695, %v1418_v50  ;;  %v1202_v50 = vadd.f32 %v3226_v13, %v3167_v46 }
0x1706   :  { %2700 = vpow2.f32 %v2162_v40 }
0x170e   :  { %v2699_v52 = vpop.eup %2698 }
0x170f   :  { %1428 = vrot.lane.b32.xlu1 %v2699_v52, %s2857_s15 }
0x1710   :  { %v2701_v55 = vpop.eup %2700 }
0x1711   :  { %v1422_v56 = vadd.f32 1.0, %v2701_v55 }
0x1713   :  { %2702 = vrcp.f32 %v1422_v56 }
0x171d   :  { %v2703_v57 = vpop.eup %2702 }
0x171e   :  { %v1426_v62 = vmul.f32 %v2703_v57, %v1333_v26 }
0x1726   :  { %v1061_v53 = vpop.permute.xlu0 %1060 }
0x1727   :  { %2143 = vst.msk [vmem:[%s3406_s7 + $0x38] sm:$0xff] %vm78_vm1, %v1061_v53  ;;  %1065 = vst.msk [vmem:[#allocation8] sm:$0xff] %vm78_vm1, %v1061_v53 }
0x172e   :  { %v1078_v54 = vld [vmem:[%s3406_s7 + $0x38] sm:$0xff] }
0x172f   :  { %2412 = vmatmul.mubr.msk.f32.gmra.mrb[20].mxu0 %vm78_vm1, %v1078_v54 }
0x1730   :  { %2444 = vmatprep.mubr.msk.f32.mxu0 %vm2855_vm0, %v2856_v1 }
0x1781   :  { %v1429_v59 = vpop.permute.xlu1 %1428 }
0x1782   :  { %v1431_v60 = vmul.f32 %v2703_v57, %v1429_v59 }
0x1784   :  { %1433 = vrot.lane.b32.xlu1 %v1431_v60, %s2858_s16 }
0x17f6   :  { %v1434_v63 = vpop.permute.xlu1 %1433 }
0x17f7   :  { %v1436_v2 = vadd.f32 %v1434_v63, %v1426_v62 }
0x17f9   :  { %2704 = vtanh.f32 %v1436_v2 }
0x1802   :  { %v3267_v4 = vpop.f32.mrb[20].mxu0 }
0x1803   :  { %v2705_v7 = vpop.eup %2704  ;;  %v3269_v8 = vpop.f32.mrb[21].mxu0 }
0x1804   :  { %1439 = vrot.lane.b32.xlu1 %v2705_v7, %s2857_s15 }
0x1876   :  { %v1440_v10 = vpop.permute.xlu1 %1439 }
0x1877   :  { %v1442_v11 = vmul.f32 %v2703_v57, %v1440_v10 }
0x1879   :  { %1444 = vrot.lane.b32.xlu1 %v1442_v11, %s2858_s16 }
0x18eb   :  { %v1445_v9 = vpop.permute.xlu1 %1444 }
0x18ec   :  { %2163 = vst.msk [vmem:[%s3406_s7 + $0x8] sm:$0xff] %vm78_vm1, %v1445_v9  ;;  %2445 = vmatmul.mubr.msk.f32.vlgmr.msra.gmra.mrb[22].mxu0 %vm78_vm1, %v1445_v9  ;;  %v1207_v9 = vadd.f32 %v3165_v45, %v3226_v13 }
0x18ed   :  { %2592 = vmatpush3.bf16.msra.mxu0 %v3180_v58  ;;  %2466 = vmatprep.mubr.msk.f32.mxu0 %vm2855_vm0, %v2856_v1 }
0x18ee   :  { %2593 = vmatprep.subr.bf16.mxu0 %v2854_v0 }
0x18f1   :  { %2595 = vmatpush3.bf16.msra.mxu0 %v3190_v61 }
0x18f2   :  { %2602 = vmatprep.subr.bf16.mxu0 %v2854_v0 }
0x19bf   :  { %v1517_v15 = vpop.f32.mrb[22].mxu0 }
0x19c0   :  { %v1521_v16 = vadd.f32 %v1517_v15, %v1192_v12  ;;  %v2446_v14 = vpop.f32.mrb[23].mxu0 }
0x19c2   :  { %2706 = vtanh.f32 %v1521_v16  ;;  %v2165_v19 = vmul.f32 -1.442695, %v1521_v16 }
0x19c4   :  { %2708 = vpow2.f32 %v2165_v19 }
0x19cc   :  { %v2707_v18 = vpop.eup %2706 }
0x19cd   :  { %1531 = vrot.lane.b32.xlu0 %v2707_v18, %s2857_s15 }
0x19ce   :  { %v2709_v3 = vpop.eup %2708 }
0x19cf   :  { %v1525_v17 = vadd.f32 1.0, %v2709_v3 }
0x19d1   :  { %2710 = vrcp.f32 %v1525_v17 }
0x19db   :  { %v2711_v5 = vpop.eup %2710 }
0x19dc   :  { %v1529_v22 = vmul.f32 %v2711_v5, %v1436_v2 }
0x1a3f   :  { %v1532_v20 = vpop.permute.xlu0 %1531 }
0x1a40   :  { %v1534_v21 = vmul.f32 %v2711_v5, %v1532_v20 }
0x1a42   :  { %1536 = vrot.lane.b32.xlu1 %v1534_v21, %s2858_s16 }
0x1ab4   :  { %v1537_v23 = vpop.permute.xlu1 %1536 }
0x1ab5   :  { %v1539_v44 = vadd.f32 %v1537_v23, %v1529_v22  ;;  %v1212_v23 = vadd.f32 %v3226_v13, %v3269_v8 }
0x1ab7   :  { %2712 = vtanh.f32 %v1539_v44 }
0x1ac1   :  { %v2713_v24 = vpop.eup %2712 }
0x1ac2   :  { %1542 = vrot.lane.b32.xlu0 %v2713_v24, %s2857_s15 }
0x1b34   :  { %v1543_v25 = vpop.permute.xlu0 %1542 }
0x1b35   :  { %v1545_v26 = vmul.f32 %v2711_v5, %v1543_v25 }
0x1b37   :  { %1547 = vrot.lane.b32.xlu1 %v1545_v26, %s2858_s16 }
0x1ba9   :  { %v1548_v27 = vpop.permute.xlu1 %1547 }
0x1baa   :  { %2166 = vst.msk [vmem:[%s3406_s7 + $0x10] sm:$0xff] %vm78_vm1, %v1548_v27  ;;  %2456 = vmatmul.mubr.msk.f32.vlgmr.msra.gmra.mrb[14].mxu1 %vm78_vm1, %v1548_v27 }
0x1bab   :  { %2598 = vmatpush3.bf16.msra.mxu1 %v3180_v58  ;;  %2477 = vmatprep.mubr.msk.f32.mxu1 %vm2855_vm0, %v2856_v1 }
0x1bac   :  { %2599 = vmatprep.subr.bf16.mxu1 %v2854_v0 }
0x1baf   :  { %2601 = vmatpush3.bf16.msra.mxu1 %v3190_v61 }
0x1bb0   :  { %2608 = vmatprep.subr.bf16.mxu1 %v2854_v0 }
0x1c7d   :  { %v1620_v29 = vpop.f32.mrb[14].mxu1 }
0x1c7e   :  { %v1624_v30 = vadd.f32 %v1620_v29, %v1197_v28  ;;  %v2457_v31 = vpop.f32.mrb[15].mxu1 }
0x1c80   :  { %2714 = vtanh.f32 %v1624_v30  ;;  %v2168_v33 = vmul.f32 -1.442695, %v1624_v30 }
0x1c82   :  { %2716 = vpow2.f32 %v2168_v33 }
0x1c8a   :  { %v2715_v32 = vpop.eup %2714 }
0x1c8b   :  { %1634 = vrot.lane.b32.xlu0 %v2715_v32, %s2857_s15 }
0x1c8c   :  { %v2717_v34 = vpop.eup %2716 }
0x1c8d   :  { %v1628_v35 = vadd.f32 1.0, %v2717_v34 }
0x1c8f   :  { %2718 = vrcp.f32 %v1628_v35 }
0x1c99   :  { %v2719_v36 = vpop.eup %2718 }
0x1c9a   :  { %v1632_v39 = vmul.f32 %v2719_v36, %v1539_v44 }
0x1cfd   :  { %v1635_v37 = vpop.permute.xlu0 %1634 }
0x1cfe   :  { %v1637_v38 = vmul.f32 %v2719_v36, %v1635_v37 }
0x1d00   :  { %1639 = vrot.lane.b32.xlu1 %v1637_v38, %s2858_s16 }
0x1d72   :  { %v1640_v43 = vpop.permute.xlu1 %1639 }
0x1d73   :  { %v1642_v42 = vadd.f32 %v1640_v43, %v1632_v39  ;;  %v1217_v39 = vadd.f32 %v3267_v4, %v3226_v13 }
0x1d75   :  { %2720 = vtanh.f32 %v1642_v42 }
0x1d7f   :  { %v2721_v47 = vpop.eup %2720 }
0x1d80   :  { %1645 = vrot.lane.b32.xlu0 %v2721_v47, %s2857_s15 }
0x1df2   :  { %v1646_v6 = vpop.permute.xlu0 %1645 }
0x1df3   :  { %v1648_v48 = vmul.f32 %v2719_v36, %v1646_v6 }
0x1df5   :  { %1650 = vrot.lane.b32.xlu1 %v1648_v48, %s2858_s16 }
0x1e67   :  { %v1651_v49 = vpop.permute.xlu1 %1650 }
0x1e68   :  { %2169 = vst.msk [vmem:[%s3406_s7 + $0x18] sm:$0xff] %vm78_vm1, %v1651_v49  ;;  %2467 = vmatmul.mubr.msk.f32.vlgmr.msra.gmra.mrb[24].mxu0 %vm78_vm1, %v1651_v49 }
0x1e69   :  { %2604 = vmatpush3.bf16.msra.mxu0 %v3180_v58  ;;  %2488 = vmatprep.mubr.msk.f32.mxu0 %vm2855_vm0, %v2856_v1 }
0x1e6a   :  { %2605 = vmatprep.subr.bf16.mxu0 %v2854_v0 }
0x1e6d   :  { %2607 = vmatpush3.bf16.msra.mxu0 %v3190_v61 }
0x1f3b   :  { %v1723_v51 = vpop.f32.mrb[24].mxu0 }
0x1f3c   :  { %v1727_v52 = vadd.f32 %v1723_v51, %v1202_v50  ;;  %v2468_v53 = vpop.f32.mrb[25].mxu0 }
0x1f3e   :  { %2722 = vtanh.f32 %v1727_v52  ;;  %v2171_v40 = vmul.f32 -1.442695, %v1727_v52 }
0x1f40   :  { %2724 = vpow2.f32 %v2171_v40 }
0x1f48   :  { %v2723_v54 = vpop.eup %2722 }
0x1f49   :  { %1737 = vrot.lane.b32.xlu0 %v2723_v54, %s2857_s15 }
0x1f4a   :  { %v2725_v55 = vpop.eup %2724 }
0x1f4b   :  { %v1731_v56 = vadd.f32 1.0, %v2725_v55 }
0x1f4d   :  { %2726 = vrcp.f32 %v1731_v56 }
0x1f57   :  { %v2727_v57 = vpop.eup %2726 }
0x1f58   :  { %v1735_v62 = vmul.f32 %v2727_v57, %v1642_v42 }
0x1fbb   :  { %v1738_v59 = vpop.permute.xlu0 %1737 }
0x1fbc   :  { %v1740_v60 = vmul.f32 %v2727_v57, %v1738_v59 }
0x1fbe   :  { %1742 = vrot.lane.b32.xlu1 %v1740_v60, %s2858_s16 }
0x2030   :  { %v1743_v63 = vpop.permute.xlu1 %1742 }
0x2031   :  { %v1745_v46 = vadd.f32 %v1743_v63, %v1735_v62 }
0x2033   :  { %2728 = vtanh.f32 %v1745_v46 }
0x203d   :  { %v2729_v2 = vpop.eup %2728 }
0x203e   :  { %1748 = vrot.lane.b32.xlu0 %v2729_v2, %s2857_s15 }
0x20b0   :  { %v1749_v7 = vpop.permute.xlu0 %1748 }
0x20b1   :  { %v1751_v10 = vmul.f32 %v2727_v57, %v1749_v7 }
0x20b3   :  { %1753 = vrot.lane.b32.xlu1 %v1751_v10, %s2858_s16 }
0x2125   :  { %v1754_v11 = vpop.permute.xlu1 %1753 }
0x2126   :  { %2172 = vst.msk [vmem:[%s3406_s7 + $0x20] sm:$0xff] %vm78_vm1, %v1754_v11  ;;  %2478 = vmatmul.mubr.msk.f32.vlgmr.msra.gmra.mrb[16].mxu1 %vm78_vm1, %v1754_v11 }
0x2127   :  { %2610 = vmatpush3.bf16.msra.mxu1 %v3180_v58  ;;  %2499 = vmatprep.mubr.msk.f32.mxu1 %vm2855_vm0, %v2856_v1 }
0x2128   :  { %2611 = vmatprep.subr.bf16.mxu1 %v2854_v0 }
0x212b   :  { %2613 = vmatpush3.bf16.msra.mxu1 %v3190_v61 }
0x21f9   :  { %v1826_v12 = vpop.f32.mrb[16].mxu1 }
0x21fa   :  { %v1830_v15 = vadd.f32 %v1826_v12, %v1207_v9  ;;  %v2479_v16 = vpop.f32.mrb[17].mxu1 }
0x21fc   :  { %2730 = vtanh.f32 %v1830_v15  ;;  %v2174_v18 = vmul.f32 -1.442695, %v1830_v15 }
0x21fe   :  { %2732 = vpow2.f32 %v2174_v18 }
0x2206   :  { %v2731_v14 = vpop.eup %2730 }
0x2207   :  { %1840 = vrot.lane.b32.xlu0 %v2731_v14, %s2857_s15 }
0x2208   :  { %v2733_v58 = vpop.eup %2732 }
0x2209   :  { %v1834_v19 = vadd.f32 1.0, %v2733_v58 }
0x220b   :  { %2734 = vrcp.f32 %v1834_v19 }
0x2215   :  { %v2735_v1 = vpop.eup %2734 }
0x2216   :  { %v1838_v61 = vmul.f32 %v2735_v1, %v1745_v46 }
0x2279   :  { %v1841_v3 = vpop.permute.xlu0 %1840 }
0x227a   :  { %v1843_v0 = vmul.f32 %v2735_v1, %v1841_v3 }
0x227c   :  { %1845 = vrot.lane.b32.xlu1 %v1843_v0, %s2858_s16 }
0x22ee   :  { %v1846_v17 = vpop.permute.xlu1 %1845 }
0x22ef   :  { %v1848_v45 = vadd.f32 %v1846_v17, %v1838_v61 }
0x22f1   :  { %2736 = vtanh.f32 %v1848_v45 }
0x22fb   :  { %v2737_v5 = vpop.eup %2736 }
0x22fc   :  { %1851 = vrot.lane.b32.xlu0 %v2737_v5, %s2857_s15 }
0x236e   :  { %v1852_v20 = vpop.permute.xlu0 %1851 }
0x236f   :  { %v1854_v21 = vmul.f32 %v2735_v1, %v1852_v20 }
0x2371   :  { %1856 = vrot.lane.b32.xlu1 %v1854_v21, %s2858_s16 }
0x23e3   :  { %v1857_v22 = vpop.permute.xlu1 %1856 }
0x23e4   :  { %2175 = vst.msk [vmem:[%s3406_s7 + $0x28] sm:$0xff] %vm78_vm1, %v1857_v22  ;;  %2489 = vmatmul.mubr.msk.f32.vlgmr.msra.gmra.mrb[26].mxu0 %vm78_vm1, %v1857_v22 }
0x24b7   :  { %v1929_v44 = vpop.f32.mrb[26].mxu0 }
0x24b8   :  { %v1933_v24 = vadd.f32 %v1929_v44, %v1212_v23  ;;  %v2490_v25 = vpop.f32.mrb[27].mxu0 }
0x24ba   :  { %2738 = vtanh.f32 %v1933_v24  ;;  %v2177_v27 = vmul.f32 -1.442695, %v1933_v24 }
0x24bc   :  { %2740 = vpow2.f32 %v2177_v27 }
0x24c4   :  { %v2739_v26 = vpop.eup %2738 }
0x24c5   :  { %1943 = vrot.lane.b32.xlu0 %v2739_v26, %s2857_s15 }
0x24c6   :  { %v2741_v28 = vpop.eup %2740 }
0x24c7   :  { %v1937_v29 = vadd.f32 1.0, %v2741_v28 }
0x24c9   :  { %2742 = vrcp.f32 %v1937_v29 }
0x24d3   :  { %v2743_v30 = vpop.eup %2742 }
0x24d4   :  { %v1941_v33 = vmul.f32 %v2743_v30, %v1848_v45 }
0x2537   :  { %v1944_v31 = vpop.permute.xlu0 %1943 }
0x2538   :  { %v1946_v32 = vmul.f32 %v2743_v30, %v1944_v31 }
0x253a   :  { %1948 = vrot.lane.b32.xlu1 %v1946_v32, %s2858_s16 }
0x25ac   :  { %v1949_v34 = vpop.permute.xlu1 %1948 }
0x25ad   :  { %v1951_v8 = vadd.f32 %v1949_v34, %v1941_v33 }
0x25af   :  { %2744 = vtanh.f32 %v1951_v8 }
0x25b9   :  { %v2745_v35 = vpop.eup %2744 }
0x25ba   :  { %1954 = vrot.lane.b32.xlu0 %v2745_v35, %s2857_s15 }
0x262c   :  { %v1955_v36 = vpop.permute.xlu0 %1954 }
0x262d   :  { %v1957_v37 = vmul.f32 %v2743_v30, %v1955_v36 }
0x262f   :  { %1959 = vrot.lane.b32.xlu1 %v1957_v37, %s2858_s16 }
0x26a1   :  { %v1960_v38 = vpop.permute.xlu1 %1959 }
0x26a2   :  { %2178 = vst.msk [vmem:[%s3406_s7 + $0x30] sm:$0xff] %vm78_vm1, %v1960_v38  ;;  %2500 = vmatmul.mubr.msk.f32.vlgmr.msra.gmra.mrb[18].mxu1 %vm78_vm1, %v1960_v38 }
0x2775   :  { %v2032_v43 = vpop.f32.mrb[18].mxu1 }
0x2776   :  { %v2036_v42 = vadd.f32 %v2032_v43, %v1217_v39  ;;  %v2501_v47 = vpop.f32.mrb[19].mxu1 }
0x2778   :  { %2746 = vtanh.f32 %v2036_v42  ;;  %v2180_v48 = vmul.f32 -1.442695, %v2036_v42 }
0x277a   :  { %2748 = vpow2.f32 %v2180_v48 }
0x2782   :  { %v2747_v6 = vpop.eup %2746 }
0x2783   :  { %2046 = vrot.lane.b32.xlu0 %v2747_v6, %s2857_s15 }
0x2784   :  { %v2749_v49 = vpop.eup %2748 }
0x2785   :  { %v2040_v50 = vadd.f32 1.0, %v2749_v49 }
0x2787   :  { %2750 = vrcp.f32 %v2040_v50 }
0x2791   :  { %v2751_v51 = vpop.eup %2750 }
0x2792   :  { %v2044_v13 = vmul.f32 %v2751_v51, %v1951_v8 }
0x27f5   :  { %v2047_v52 = vpop.permute.xlu0 %2046 }
0x27f6   :  { %v2049_v53 = vmul.f32 %v2751_v51, %v2047_v52 }
0x27f8   :  { %2051 = vrot.lane.b32.xlu1 %v2049_v53, %s2858_s16 }
0x27fc   :  { %1067 = vrot.lane.b32.xlu1 %v3245_v41, %s2859_s3 }
0x286a   :  { %v2052_v4 = vpop.permute.xlu1 %2051 }
0x286b   :  { %v2054_v54 = vadd.f32 %v2052_v4, %v2044_v13 }
0x286d   :  { %2752 = vtanh.f32 %v2054_v54  ;;  %2069 = vrot.lane.b32.xlu1 %v2054_v54, %s2859_s3 }
0x286e   :  { %v1068_v40 = vpop.permute.xlu1 %1067 }
0x286f   :  { %1070 = vst.msk [vmem:[#allocation9] sm:$0xff] %vm78_vm1, %v1068_v40 }
0x2877   :  { %v2753_v55 = vpop.eup %2752 }
0x2878   :  { %2057 = vrot.lane.b32.xlu0 %v2753_v55, %s2857_s15 }
0x28df   :  { %v2070_v56 = vpop.permute.xlu1 %2069 }
0x28e0   :  { %2073 = vst.msk [vmem:[#allocation9 + $0x8] sm:$0xff] %vm78_vm1, %v2070_v56 }
0x28e1   :  { %2809 = shalt.err (!%p2806_p6)
}
0x28e2   :  { %s2810_s4 = scalar_lea.hbm %s3408_s9, 256 }
0x28e3   :  { %p2811_p7 = scmp.ne.s32.totalorder %s3408_s9, %s2810_s4  ;;  %p2814_p8 = scmp.lt.u32.totalorder %s2810_s4, %s3408_s9 }
0x28e5   :  { %p2816_p9 = pnand %p2814_p8, %p2811_p7 }
0x28e7   :  { %2819 = shalt.err (!%p2816_p9)
}
0x28e8   :  { %2099 = dma.vmem_to_hbm [thread:$0]  %s2094_s23, 256, %s3408_s9, [#allocation10], %s2851_s19, %s2851_s19, %s2852_s20  }
0x28e9   :  { %s2861_s11 = smov [#allocation8]  }
0x28ea   :  { %v2058_v41 = vpop.permute.xlu0 %2057  ;;  %s2081_s0 = sshll.u32 %s2861_s11, 4  ;;  %s2082_s0 = int_to_ptr.vmem [resolvable:$true] %s2081_s0 }
0x28eb   :  { %v2060_v57 = vmul.f32 %v2751_v51, %v2058_v41  ;;  %s2820_s2 = scalar_lea.vmem %s2082_s0, 256  ;;  %p2825_p11 = scmp.lt.s32.totalorder %s2082_s0, %s2082_s0 }
0x28ec   :  { %p2821_p10 = scmp.ne.s32.totalorder %s2082_s0, %s2820_s2  ;;  %p2826_p12 = scmp.lt.s32.totalorder %s2820_s2, %s2820_s2 }
0x28ed   :  { %2062 = vrot.lane.b32.xlu0 %v2060_v57, %s2858_s16 }
0x28ee   :  { %p2827_p13 = por %p2826_p12, %p2825_p11 }
0x28f0   :  { %p2828_p0 = pnand %p2827_p13, %p2821_p10 }
0x295f   :  { %v2063_v59 = vpop.permute.xlu0 %2062 }
0x2960   :  { %2181 = vst.msk [vmem:[%s3406_s7 + $0x38] sm:$0xff] %vm78_vm1, %v2063_v59  ;;  %2067 = vst.msk [vmem:[#allocation8 + $0x8] sm:$0xff] %vm78_vm1, %v2063_v59 }
0x2961   :  { %2831 = shalt.err (!%p2828_p0)
}
0x2962   :  { %s2832_s10 = scalar_lea.hbm %s3407_s8, 256 }
0x2963   :  { %p2833_p1 = scmp.ne.s32.totalorder %s3407_s8, %s2832_s10  ;;  %p2836_p2 = scmp.lt.u32.totalorder %s2832_s10, %s3407_s8 }
0x2965   :  { %p2838_p3 = pnand %p2836_p2, %p2833_p1 }
0x2967   :  { %2841 = shalt.err (!%p2838_p3)
}
0x2968   :  { %2087 = dma.vmem_to_hbm [thread:$0]  %s2082_s0, 256, %s3407_s8, [#allocation5], %s2851_s19, %s2851_s19, %s2852_s20  }
0x2969   :  { %2846 = dma.done.wait [#allocation5], 256  }
0x296a   :  { %2847 = vsyncadd [#allocation5], 4294967040 }
0x296b   :  { %2848 = dma.done.wait [#allocation10], 256  }
0x296c   :  { %2849 = vsyncadd [#allocation10], 4294967040 }
0x296d   :  { %2108 = vsyncpa [#allocation4], 1 }
0x296e   :  { %2109 = vsyncpa [#allocation7], 1 }
0x296f   :  { %2110 = vsyncpa [#allocation5], 1 }
0x2970   :  { %2111 = vsyncpa [#allocation10], 1 }

</bundles_post_ra>
